<compile_context>
chip_gen: v6e
topology: v6e:2x2x1
jax: 0.10.0
libtpu: 0.0.40
codegen_flags: <defaults>
</compile_context>

<pallas_src>
import functools

import jax
import jax.numpy as jnp
from jax import lax
from jax.experimental import pallas as pl
from jax.experimental.pallas import tpu as pltpu

K = 10                    # MaxPool2d kernel size from Fan.__init__
K_EFF = 2 * K - 1         # two k=10/s=1/p=0 pools == one k=19/s=1/p=0 pool
_LANE = 128               # TPU lane width
_VMEM_BUDGET = 40 << 20   # per-step working-set target (fits v7x's 64 MiB VMEM)


def _sliding_max(x, k, axis):
    """Stride-1, window-k running max along `axis`, via log-doubling.

    Uses ~ceil(log2(k)) + 1 maxima / shifted slices per element instead of
    k - 1 (5 per axis for k=19 vs 18 linearly).
    """
    if k == 1:
        return x

    def sl(a, off, length):
        idx = [slice(None)] * a.ndim
        idx[axis] = slice(off, off + length)
        return a[tuple(idx)]

    n = x.shape[axis]
    out_len = n - k + 1
    m, w = x, 1                                   # m[i] = max over window [i, i+w)
    while 2 * w <= k:
        cur = m.shape[axis] - w
        m = jnp.maximum(sl(m, 0, cur), sl(m, w, cur))
        w *= 2
    if w == k:
        return sl(m, 0, out_len)
    # window k = [i, i+w) U [i+k-w, i+k)   (valid overlap since k - w <= w)
    return jnp.maximum(sl(m, 0, out_len), sl(m, k - w, out_len))


def _fan_pool_kernel(x_ref, o_ref, *, k):
    # x_ref: (H, W, Pblk)   o_ref: (H-k+1, W-k+1, Pblk)   (planes on lanes)
    #
    # Pass ordering matters: slicing the leading axis (H) is shift-free
    # (just VMEM address offsets), while sublane (W) slices at non-multiple-
    # of-8 offsets cost XLU rotates.  So the cheap H pass runs first over the
    # full W extent, and the sublane pass only sees the reduced H-k+1 rows.
    x = x_ref[...]
    t = _sliding_max(x, k, axis=0)            # vertical pass: leading-axis slices
    o_ref[...] = _sliding_max(t, k, axis=1)   # horizontal pass: sublane slices


def _choose_plane_block(h, w, ho, wo, p_pad, itemsize):
    # Rough per-lane bytes: double-buffered input block + double-buffered
    # output block + ~2 block-sized compute temporaries.
    per_lane = (4 * h * w + 2 * ho * wo) * itemsize
    max_p = max(_LANE, (_VMEM_BUDGET // max(per_lane, 1)) // _LANE * _LANE)
    p_blk = min(p_pad, max_p)
    while p_pad % p_blk:                      # must evenly divide padded plane count
        p_blk -= _LANE
    return p_blk


@jax.jit
def fan_forward(x):
    """Fan.forward(x) on NCHW input: MaxPool2d(10, stride=1) applied twice, fused."""
    n, c, h, w = x.shape
    ho, wo = h - K_EFF + 1, w - K_EFF + 1
    assert ho >= 1 and wo >= 1, "spatial dims too small for two 10x10 stride-1 pools"

    p = n * c
    p_pad = -(-p // _LANE) * _LANE            # lane-dense plane count
    itemsize = jnp.dtype(x.dtype).itemsize

    # Layout plumbing only (fused by XLA under jit): fold N*C onto lanes.
    x3 = jnp.transpose(x.reshape(p, h, w), (1, 2, 0))
    if p_pad != p:
        x3 = jnp.pad(x3, ((0, 0), (0, 0), (0, p_pad - p)))

    p_blk = _choose_plane_block(h, w, ho, wo, p_pad, itemsize)
    # TODO(synk): for extremely large H*W a single (H, W, 128) stack exceeds
    # VMEM; that regime needs halo row-strip tiling of H (manual DMA), which
    # typical image sizes never hit.

    block_in = h * w * p_blk * itemsize
    block_out = ho * wo * p_blk * itemsize
    vmem_need = 4 * block_in + 2 * block_out  # dbl-buffered in/out + temps
    vmem_limit = int(min(max(vmem_need + (4 << 20), 16 << 20), 56 << 20))

    cost = pl.CostEstimate(
        flops=10 * ho * wo * p_pad,           # ~10 maxima per output element
        transcendentals=0,
        bytes_accessed=(h * w + ho * wo) * p_pad * itemsize)

    out3 = pl.pallas_call(
        functools.partial(_fan_pool_kernel, k=K_EFF),
        out_shape=jax.ShapeDtypeStruct((ho, wo, p_pad), x.dtype),
        grid=(p_pad // p_blk,),
        in_specs=[pl.BlockSpec((h, w, p_blk), lambda i: (0, 0, i))],
        out_specs=pl.BlockSpec((ho, wo, p_blk), lambda i: (0, 0, i)),
        compiler_params=pltpu.CompilerParams(
            dimension_semantics=("parallel",),
            vmem_limit_bytes=vmem_limit),
        cost_estimate=cost,
    )(x3)

    # Drop lane padding and restore NCHW.
    return jnp.transpose(out3[:, :, :p], (2, 0, 1)).reshape(n, c, ho, wo)


def _fan_reference(x):
    # pure-JAX reference: the original two k=10 stride-1 VALID max pools.
    def pool(v):
        return lax.reduce_window(
            v, -jnp.inf, lax.max,
            window_dimensions=(1, 1, K, K),
            window_strides=(1, 1, 1, 1),
            padding="VALID")
    return pool(pool(x))


if __name__ == "__main__":
    key = jax.random.PRNGKey(0)
    # NCHW; H=W=28 so the fused 19x19 stride-1 pool gives 28 -> 10
    # (identical to 28 -> 19 -> 10 from the two original pools).
    x = jax.random.uniform(key, (2, 4, 28, 28), dtype=jnp.float32)

    out = jax.block_until_ready(fan_forward(x))
    ref = _fan_reference(x)

    assert out.shape == (2, 4, 10, 10), out.shape
    assert jnp.allclose(out, ref), "Pallas fused maxpool mismatch vs reference"

    print("KERNEL_OK")
</pallas_src>

<mosaic_0001>
module attributes {stable_mosaic.version = 11 : i64} {
  func.func @_fan_pool_kernel(%arg0: i32, %arg1: memref<28x28x128xf32, #tpu.memory_space<vmem>>, %arg2: memref<10x10x128xf32, #tpu.memory_space<vmem>>) attributes {dimension_semantics = [#tpu.dimension_semantics<parallel>], iteration_bounds = array<i64: 1>, scalar_prefetch = 0 : i64, scratch_operands = 0 : i64, tpu.core_type = #tpu.core_type<tc>, window_params = [{transform_indices = @transform_0, window_bounds = array<i64: 28, 28, 128>}, {transform_indices = @transform_1, window_bounds = array<i64: 10, 10, 128>}]} {
    %c0 = arith.constant 0 : index
    %c0_0 = arith.constant 0 : index
    %c0_1 = arith.constant 0 : index
    %0 = vector.load %arg1[%c0, %c0_0, %c0_1] : memref<28x28x128xf32, #tpu.memory_space<vmem>>, vector<28x28x128xf32>
    %1 = vector.extract_strided_slice %0 {offsets = [0, 0, 0], sizes = [27, 28, 128], strides = [1, 1, 1]} : vector<28x28x128xf32> to vector<27x28x128xf32>
    %2 = vector.extract_strided_slice %0 {offsets = [1, 0, 0], sizes = [27, 28, 128], strides = [1, 1, 1]} : vector<28x28x128xf32> to vector<27x28x128xf32>
    %3 = arith.maximumf %1, %2 : vector<27x28x128xf32>
    %4 = vector.extract_strided_slice %3 {offsets = [0, 0, 0], sizes = [25, 28, 128], strides = [1, 1, 1]} : vector<27x28x128xf32> to vector<25x28x128xf32>
    %5 = vector.extract_strided_slice %3 {offsets = [2, 0, 0], sizes = [25, 28, 128], strides = [1, 1, 1]} : vector<27x28x128xf32> to vector<25x28x128xf32>
    %6 = arith.maximumf %4, %5 : vector<25x28x128xf32>
    %7 = vector.extract_strided_slice %6 {offsets = [0, 0, 0], sizes = [21, 28, 128], strides = [1, 1, 1]} : vector<25x28x128xf32> to vector<21x28x128xf32>
    %8 = vector.extract_strided_slice %6 {offsets = [4, 0, 0], sizes = [21, 28, 128], strides = [1, 1, 1]} : vector<25x28x128xf32> to vector<21x28x128xf32>
    %9 = arith.maximumf %7, %8 : vector<21x28x128xf32>
    %10 = vector.extract_strided_slice %9 {offsets = [0, 0, 0], sizes = [13, 28, 128], strides = [1, 1, 1]} : vector<21x28x128xf32> to vector<13x28x128xf32>
    %11 = vector.extract_strided_slice %9 {offsets = [8, 0, 0], sizes = [13, 28, 128], strides = [1, 1, 1]} : vector<21x28x128xf32> to vector<13x28x128xf32>
    %12 = arith.maximumf %10, %11 : vector<13x28x128xf32>
    %13 = vector.extract_strided_slice %12 {offsets = [0, 0, 0], sizes = [10, 28, 128], strides = [1, 1, 1]} : vector<13x28x128xf32> to vector<10x28x128xf32>
    %14 = vector.extract_strided_slice %12 {offsets = [3, 0, 0], sizes = [10, 28, 128], strides = [1, 1, 1]} : vector<13x28x128xf32> to vector<10x28x128xf32>
    %15 = arith.maximumf %13, %14 : vector<10x28x128xf32>
    %16 = vector.extract_strided_slice %15 {offsets = [0, 0, 0], sizes = [10, 27, 128], strides = [1, 1, 1]} : vector<10x28x128xf32> to vector<10x27x128xf32>
    %17 = vector.extract_strided_slice %15 {offsets = [0, 1, 0], sizes = [10, 27, 128], strides = [1, 1, 1]} : vector<10x28x128xf32> to vector<10x27x128xf32>
    %18 = arith.maximumf %16, %17 : vector<10x27x128xf32>
    %19 = vector.extract_strided_slice %18 {offsets = [0, 0, 0], sizes = [10, 25, 128], strides = [1, 1, 1]} : vector<10x27x128xf32> to vector<10x25x128xf32>
    %20 = vector.extract_strided_slice %18 {offsets = [0, 2, 0], sizes = [10, 25, 128], strides = [1, 1, 1]} : vector<10x27x128xf32> to vector<10x25x128xf32>
    %21 = arith.maximumf %19, %20 : vector<10x25x128xf32>
    %22 = vector.extract_strided_slice %21 {offsets = [0, 0, 0], sizes = [10, 21, 128], strides = [1, 1, 1]} : vector<10x25x128xf32> to vector<10x21x128xf32>
    %23 = vector.extract_strided_slice %21 {offsets = [0, 4, 0], sizes = [10, 21, 128], strides = [1, 1, 1]} : vector<10x25x128xf32> to vector<10x21x128xf32>
    %24 = arith.maximumf %22, %23 : vector<10x21x128xf32>
    %25 = vector.extract_strided_slice %24 {offsets = [0, 0, 0], sizes = [10, 13, 128], strides = [1, 1, 1]} : vector<10x21x128xf32> to vector<10x13x128xf32>
    %26 = vector.extract_strided_slice %24 {offsets = [0, 8, 0], sizes = [10, 13, 128], strides = [1, 1, 1]} : vector<10x21x128xf32> to vector<10x13x128xf32>
    %27 = arith.maximumf %25, %26 : vector<10x13x128xf32>
    %28 = vector.extract_strided_slice %27 {offsets = [0, 0, 0], sizes = [10, 10, 128], strides = [1, 1, 1]} : vector<10x13x128xf32> to vector<10x10x128xf32>
    %29 = vector.extract_strided_slice %27 {offsets = [0, 3, 0], sizes = [10, 10, 128], strides = [1, 1, 1]} : vector<10x13x128xf32> to vector<10x10x128xf32>
    %30 = arith.maximumf %28, %29 : vector<10x10x128xf32>
    %c0_2 = arith.constant 0 : index
    %c0_3 = arith.constant 0 : index
    %c0_4 = arith.constant 0 : index
    %31 = vector.load %arg2[%c0_2, %c0_3, %c0_4] : memref<10x10x128xf32, #tpu.memory_space<vmem>>, vector<10x10x128xf32>
    tpu.vector_store %arg2[%c0_2, %c0_3, %c0_4], %30 {strides = array<i32>} : memref<10x10x128xf32, #tpu.memory_space<vmem>>, vector<10x10x128xf32>,
    return
  }
  func.func @transform_0(%arg0: i32) -> (i32, i32, i32) {
    %c0_i32 = arith.constant 0 : i32
    %c0_i32_0 = arith.constant 0 : i32
    %c0_i32_1 = arith.constant 0 : i32
    return %c0_i32, %c0_i32_0, %arg0 : i32, i32, i32
  }
  func.func @transform_1(%arg0: i32) -> (i32, i32, i32) {
    %c0_i32 = arith.constant 0 : i32
    %c0_i32_0 = arith.constant 0 : i32
    %c0_i32_1 = arith.constant 0 : i32
    return %c0_i32, %c0_i32_0, %arg0 : i32, i32, i32
  }
}

</mosaic_0001>

<bundles_post_ra>
// kernel: fan_forward.1
= control target key start
LH: loop header
LB: loop body
LE: loop exit
PB: predicated region body
PF: predicated region fallthrough
CT: control target
= control target key end

     0   :  { %vm544_vm0 = vcmask 1046528   ;;  %vm735_vm1 = vcmask 1045504   ;;  %vm926_vm2 = vcmask 1043456   ;;  %vm1097_vm3 = vcmask 1044480   ;;  %s2750_s0 = inlined_call_operand.vmem [shape: f32[28,28,128], index: 0, kind: input, shape index: {}]   ;;  %s2751_s1 = inlined_call_operand.vmem [shape: f32[10,10,128], index: 1, kind: output, shape index: {}]  }
   0x1   :  { %v8_v0 = vld [vmem:[%s2750_s0] sm:$0xff]  ;;  %v9_v1 = vld [vmem:[%s2750_s0 + $0x8] sm:$0xff]  ;;  %v10_v2 = vld [vmem:[%s2750_s0 + $0x10] sm:$0xff] }
   0x2   :  { %v11_v3 = vld [vmem:[%s2750_s0 + $0x18] sm:$0xf]  ;;  %v1217_v4 = vld [vmem:[%s2750_s0 + $0x20] sm:$0xff]  ;;  %v1222_v5 = vld [vmem:[%s2750_s0 + $0x28] sm:$0xff] }
   0x3   :  { %2859 = vst [vmem:[#allocation2_spill] sm:$0xff] %v1222_v5  ;;  %v1227_v6 = vld [vmem:[%s2750_s0 + $0x30] sm:$0xff]  ;;  %v1232_v7 = vld [vmem:[%s2750_s0 + $0x38] sm:$0xf]  ;;  %v1237_v8 = vld [vmem:[%s2750_s0 + $0x40] sm:$0xff]  ;;  %v120_v12 = vmax.f32 %v8_v0, %v1217_v4  ;;  %v121_v13 = vmax.f32 %v9_v1, %v1222_v5 }
   0x4   :  { %2860 = vst [vmem:[#allocation3_spill] sm:$0xff] %v1227_v6  ;;  %2861 = vst [vmem:[#allocation4_spill] sm:$0xff] %v1232_v7  ;;  %v1242_v9 = vld [vmem:[%s2750_s0 + $0x48] sm:$0xff]  ;;  %v1247_v10 = vld [vmem:[%s2750_s0 + $0x50] sm:$0xff]  ;;  %v122_v17 = vmax.f32 %v10_v2, %v1227_v6  ;;  %v123_v18 = vmax.f32 %v11_v3, %v1232_v7 }
   0x5   :  { %2862 = vst [vmem:[#allocation5_spill] sm:$0xff] %v1237_v8  ;;  %2863 = vst [vmem:[#allocation6_spill] sm:$0xff] %v1242_v9  ;;  %v1252_v11 = vld [vmem:[%s2750_s0 + $0x58] sm:$0xf]  ;;  %v20_v14 = vld [vmem:[%s2750_s0 + $0x60] sm:$0xff] }
   0x6   :  { %2864 = vst [vmem:[#allocation7_spill] sm:$0xff] %v1247_v10  ;;  %2865 = vst [vmem:[#allocation8_spill] sm:$0xff] %v1252_v11  ;;  %v21_v15 = vld [vmem:[%s2750_s0 + $0x68] sm:$0xff]  ;;  %v22_v16 = vld [vmem:[%s2750_s0 + $0x70] sm:$0xff]  ;;  %v1281_v24 = vmax.f32 %v1237_v8, %v20_v14 }
   0x7   :  { %v23_v21 = vld [vmem:[%s2750_s0 + $0x78] sm:$0xf]  ;;  %v24_v22 = vld [vmem:[%s2750_s0 + $0x80] sm:$0xff]  ;;  %v25_v23 = vld [vmem:[%s2750_s0 + $0x88] sm:$0xff]  ;;  %v1284_v25 = vmax.f32 %v1242_v9, %v21_v15  ;;  %v1287_v26 = vmax.f32 %v1247_v10, %v22_v16 }
   0x8   :  { %2866 = vst [vmem:[#allocation9_spill] sm:$0xff] %v1281_v24  ;;  %v26_v28 = vld [vmem:[%s2750_s0 + $0x90] sm:$0xff]  ;;  %v27_v29 = vld [vmem:[%s2750_s0 + $0x98] sm:$0xf]  ;;  %v28_v30 = vld [vmem:[%s2750_s0 + $0xa0] sm:$0xff]  ;;  %v1301_v31 = vmax.f32 %v1252_v11, %v23_v21  ;;  %v1303_v32 = vmax.f32 %v20_v14, %v24_v22  ;;  %v1305_v33 = vmax.f32 %v21_v15, %v25_v23  ;;  %v1325_v41 = vmax.f32 %v120_v12, %v1281_v24 }
   0x9   :  { %2867 = vst [vmem:[#allocation10_spill] sm:$0xff] %v1284_v25  ;;  %2868 = vst [vmem:[#allocation11_spill] sm:$0xff] %v1287_v26  ;;  %v29_v35 = vld [vmem:[%s2750_s0 + $0xa8] sm:$0xff]  ;;  %v30_v36 = vld [vmem:[%s2750_s0 + $0xb0] sm:$0xff]  ;;  %v1318_v38 = vmax.f32 %v22_v16, %v26_v28  ;;  %v1320_v39 = vmax.f32 %v23_v21, %v27_v29  ;;  %v1322_v40 = vmax.f32 %v24_v22, %v28_v30 }
   0xa   :  { %2869 = vst [vmem:[#allocation12_spill] sm:$0xff] %v1301_v31  ;;  %v31_v37 = vld [vmem:[%s2750_s0 + $0xb8] sm:$0xf]  ;;  %v32_v42 = vld [vmem:[%s2750_s0 + $0xc0] sm:$0xff]  ;;  %v33_v43 = vld [vmem:[%s2750_s0 + $0xc8] sm:$0xff]  ;;  %v1336_v45 = vmax.f32 %v25_v23, %v29_v35  ;;  %v1338_v46 = vmax.f32 %v26_v28, %v30_v36  ;;  %v1343_v48 = vmax.f32 %v121_v13, %v1284_v25  ;;  %v1361_v55 = vmax.f32 %v122_v17, %v1287_v26 }
   0xb   :  { %2870 = vst [vmem:[#allocation13_spill] sm:$0xff] %v1322_v40  ;;  %v34_v44 = vld [vmem:[%s2750_s0 + $0xd0] sm:$0xff]  ;;  %v1340_v47 = vmax.f32 %v27_v29, %v31_v37  ;;  %v35_v49 = vld [vmem:[%s2750_s0 + $0xd8] sm:$0xf]  ;;  %v36_v50 = vld [vmem:[%s2750_s0 + $0xe0] sm:$0xff]  ;;  %v1354_v52 = vmax.f32 %v28_v30, %v32_v42  ;;  %v1356_v53 = vmax.f32 %v29_v35, %v33_v43  ;;  %v1379_v62 = vmax.f32 %v123_v18, %v1301_v31 }
   0xc   :  { %2871 = vst [vmem:[#allocation14_spill] sm:$0xff] %v1336_v45  ;;  %2872 = vst [vmem:[#allocation15_spill] sm:$0xff] %v1338_v46  ;;  %v37_v51 = vld [vmem:[%s2750_s0 + $0xe8] sm:$0xff]  ;;  %v1358_v54 = vmax.f32 %v30_v36, %v34_v44  ;;  %v38_v56 = vld [vmem:[%s2750_s0 + $0xf0] sm:$0xff]  ;;  %v1372_v59 = vmax.f32 %v31_v37, %v35_v49  ;;  %v1374_v60 = vmax.f32 %v32_v42, %v36_v50 }
   0xd   :  { %2873 = vst [vmem:[#allocation16_spill] sm:$0xff] %v1340_v47  ;;  %v39_v57 = vld [vmem:[%s2750_s0 + $0xf8] sm:$0xf]  ;;  %v40_v58 = vld [vmem:[%s2750_s0 + $0x100] sm:$0xff]  ;;  %v1376_v61 = vmax.f32 %v33_v43, %v37_v51  ;;  %v41_v63 = vld [vmem:[%s2750_s0 + $0x108] sm:$0xff]  ;;  %v1390_v2 = vmax.f32 %v34_v44, %v38_v56 }
   0xe   :  { %2874 = vst [vmem:[#allocation17_spill] sm:$0xff] %v1374_v60  ;;  %v42_v0 = vld [vmem:[%s2750_s0 + $0x110] sm:$0xff]  ;;  %v43_v1 = vld [vmem:[%s2750_s0 + $0x118] sm:$0xf]  ;;  %v1392_v3 = vmax.f32 %v35_v49, %v39_v57  ;;  %v1394_v12 = vmax.f32 %v36_v50, %v40_v58  ;;  %v44_v14 = vld [vmem:[%s2750_s0 + $0x120] sm:$0xff]  ;;  %v1407_v17 = vmax.f32 %v37_v51, %v41_v63 }
   0xf   :  { %2875 = vst [vmem:[#allocation18_spill] sm:$0xff] %v1376_v61  ;;  %2876 = vst [vmem:[#allocation19_spill] sm:$0xff] %v1390_v2  ;;  %v45_v15 = vld [vmem:[%s2750_s0 + $0x128] sm:$0xff]  ;;  %v46_v16 = vld [vmem:[%s2750_s0 + $0x130] sm:$0xff]  ;;  %v1409_v18 = vmax.f32 %v38_v56, %v42_v0  ;;  %v1411_v21 = vmax.f32 %v39_v57, %v43_v1  ;;  %v1424_v30 = vmax.f32 %v40_v58, %v44_v14 }
  0x10   :  { %2877 = vst [vmem:[#allocation20_spill] sm:$0xff] %v1392_v3  ;;  %2878 = vst [vmem:[#allocation21_spill] sm:$0xff] %v1394_v12  ;;  %v47_v23 = vld [vmem:[%s2750_s0 + $0x138] sm:$0xf]  ;;  %v48_v28 = vld [vmem:[%s2750_s0 + $0x140] sm:$0xff]  ;;  %v1426_v35 = vmax.f32 %v41_v63, %v45_v15  ;;  %v1428_v36 = vmax.f32 %v42_v0, %v46_v16  ;;  %v1485_v19 = vmax.f32 %v1336_v45, %v1376_v61 }
  0x11   :  { %2879 = vst [vmem:[#allocation22_spill] sm:$0xff] %v1407_v17  ;;  %2880 = vst [vmem:[#allocation23_spill] sm:$0xff] %v1409_v18  ;;  %v49_v29 = vld [vmem:[%s2750_s0 + $0x148] sm:$0xff]  ;;  %v50_v42 = vld [vmem:[%s2750_s0 + $0x150] sm:$0xff]  ;;  %v1441_v49 = vmax.f32 %v43_v1, %v47_v23  ;;  %v1443_v50 = vmax.f32 %v44_v14, %v48_v28  ;;  %v1504_v13 = vmax.f32 %v1338_v46, %v1390_v2 }
  0x12   :  { %2881 = vst [vmem:[#allocation24_spill] sm:$0xff] %v1411_v21  ;;  %2882 = vst [vmem:[#allocation25_spill] sm:$0xff] %v1424_v30  ;;  %v51_v43 = vld [vmem:[%s2750_s0 + $0x158] sm:$0xf]  ;;  %v52_v44 = vld [vmem:[%s2750_s0 + $0x160] sm:$0xff]  ;;  %v1445_v51 = vmax.f32 %v45_v15, %v49_v29  ;;  %v1458_v0 = vmax.f32 %v46_v16, %v50_v42  ;;  %v1466_v15 = vmax.f32 %v1322_v40, %v1374_v60 }
  0x13   :  { %2883 = vst [vmem:[#allocation26_spill] sm:$0xff] %v1426_v35  ;;  %2884 = vst [vmem:[#allocation27_spill] sm:$0xff] %v1428_v36  ;;  %v53_v57 = vld [vmem:[%s2750_s0 + $0x168] sm:$0xff]  ;;  %v54_v58 = vld [vmem:[%s2750_s0 + $0x170] sm:$0xff]  ;;  %v1460_v1 = vmax.f32 %v47_v23, %v51_v43  ;;  %v1462_v14 = vmax.f32 %v48_v28, %v52_v44  ;;  %v1523_v2 = vmax.f32 %v1340_v47, %v1392_v3 }
  0x14   :  { %2885 = vst [vmem:[#allocation28_spill] sm:$0xff] %v1441_v49  ;;  %2886 = vst [vmem:[#allocation29_spill] sm:$0xff] %v1443_v50  ;;  %v55_v63 = vld [vmem:[%s2750_s0 + $0x178] sm:$0xf]  ;;  %v56_v34 = vld [vmem:[%s2750_s0 + $0x180] sm:$0xff]  ;;  %v1477_v23 = vmax.f32 %v49_v29, %v53_v57  ;;  %v1479_v28 = vmax.f32 %v50_v42, %v54_v58  ;;  %v1542_v3 = vmax.f32 %v1394_v12, %v1443_v50 }
  0x15   :  { %2887 = vst [vmem:[#allocation30_spill] sm:$0xff] %v1445_v51  ;;  %2888 = vst [vmem:[#allocation31_spill] sm:$0xff] %v1458_v0  ;;  %v57_v27 = vld [vmem:[%s2750_s0 + $0x188] sm:$0xff]  ;;  %v58_v16 = vld [vmem:[%s2750_s0 + $0x190] sm:$0xff]  ;;  %v1481_v20 = vmax.f32 %v51_v43, %v55_v63  ;;  %v1496_v42 = vmax.f32 %v52_v44, %v56_v34  ;;  %v1561_v40 = vmax.f32 %v1407_v17, %v1445_v51 }
  0x16   :  { %2889 = vst [vmem:[#allocation32_spill] sm:$0xff] %v1460_v1  ;;  %2890 = vst [vmem:[#allocation33_spill] sm:$0xff] %v1462_v14  ;;  %v59_v56 = vld [vmem:[%s2750_s0 + $0x198] sm:$0xf]  ;;  %v60_v37 = vld [vmem:[%s2750_s0 + $0x1a0] sm:$0xff]  ;;  %v1498_v43 = vmax.f32 %v53_v57, %v57_v27  ;;  %v1500_v22 = vmax.f32 %v54_v58, %v58_v16  ;;  %v1584_v17 = vmax.f32 %v1409_v18, %v1458_v0 }
  0x17   :  { %2891 = vst [vmem:[#allocation34_spill] sm:$0xff] %v1477_v23  ;;  %2892 = vst [vmem:[#allocation35_spill] sm:$0xff] %v1479_v28  ;;  %v61_v29 = vld [vmem:[%s2750_s0 + $0x1a8] sm:$0xff]  ;;  %v62_v61 = vld [vmem:[%s2750_s0 + $0x1b0] sm:$0xff]  ;;  %v1515_v57 = vmax.f32 %v55_v63, %v59_v56  ;;  %v1517_v58 = vmax.f32 %v56_v34, %v60_v37  ;;  %v1611_v18 = vmax.f32 %v1411_v21, %v1460_v1 }
  0x18   :  { %2893 = vst [vmem:[#allocation36_spill] sm:$0xff] %v1481_v20  ;;  %2894 = vst [vmem:[#allocation37_spill] sm:$0xff] %v1496_v42  ;;  %v63_v60 = vld [vmem:[%s2750_s0 + $0x1b8] sm:$0xf]  ;;  %v64_v44 = vld [vmem:[%s2750_s0 + $0x1c0] sm:$0xff]  ;;  %v1519_v31 = vmax.f32 %v57_v27, %v61_v29  ;;  %v1534_v34 = vmax.f32 %v58_v16, %v62_v61  ;;  %v1630_v1 = vmax.f32 %v1424_v30, %v1462_v14 }
  0x19   :  { %2895 = vst [vmem:[#allocation38_spill] sm:$0xff] %v1498_v43  ;;  %2896 = vst [vmem:[#allocation39_spill] sm:$0xff] %v1517_v58  ;;  %v65_v26 = vld [vmem:[%s2750_s0 + $0x1c8] sm:$0xff]  ;;  %v66_v46 = vld [vmem:[%s2750_s0 + $0x1d0] sm:$0xff]  ;;  %v1536_v27 = vmax.f32 %v59_v56, %v63_v60  ;;  %v1538_v25 = vmax.f32 %v60_v37, %v64_v44  ;;  %v1634_v21 = vmax.f32 %v1426_v35, %v1477_v23 }
  0x1a   :  { %2897 = vst [vmem:[#allocation40_spill] sm:$0xff] %v1519_v31  ;;  %v67_v63 = vld [vmem:[%s2750_s0 + $0x1d8] sm:$0xf]  ;;  %2898 = vst [vmem:[#allocation41_spill] sm:$0xff] %v1534_v34  ;;  %v68_v47 = vld [vmem:[%s2750_s0 + $0x1e0] sm:$0xff]  ;;  %v1553_v56 = vmax.f32 %v61_v29, %v65_v26  ;;  %v1555_v37 = vmax.f32 %v62_v61, %v66_v46  ;;  %v1647_v14 = vmax.f32 %v1428_v36, %v1479_v28 }
  0x1b   :  { %2899 = vst [vmem:[#allocation42_spill] sm:$0xff] %v1536_v27  ;;  %2900 = vst [vmem:[#allocation43_spill] sm:$0xff] %v1538_v25  ;;  %v69_v45 = vld [vmem:[%s2750_s0 + $0x1e8] sm:$0xff]  ;;  %v70_v16 = vld [vmem:[%s2750_s0 + $0x1f0] sm:$0xff]  ;;  %v1557_v24 = vmax.f32 %v63_v60, %v67_v63  ;;  %v1576_v60 = vmax.f32 %v64_v44, %v68_v47  ;;  %v1651_v23 = vmax.f32 %v1441_v49, %v1481_v20 }
  0x1c   :  { %2901 = vst [vmem:[#allocation44_spill] sm:$0xff] %v1542_v3  ;;  %2902 = vst [vmem:[#allocation45_spill] sm:$0xff] %v1553_v56  ;;  %v71_v50 = vld [vmem:[%s2750_s0 + $0x1f8] sm:$0xf]  ;;  %v1569_v12 = vld [vmem:[%s2750_s0 + $0x200] sm:$0xff]  ;;  %v1578_v29 = vmax.f32 %v65_v26, %v69_v45  ;;  %v1580_v51 = vmax.f32 %v66_v46, %v70_v16  ;;  %v1655_v35 = vmax.f32 %v1496_v42, %v1538_v25 }
  0x1d   :  { %2903 = vst [vmem:[#allocation46_spill] sm:$0xff] %v1555_v37  ;;  %2904 = vst [vmem:[#allocation47_spill] sm:$0xff] %v1557_v24  ;;  %v1574_v61 = vld [vmem:[%s2750_s0 + $0x208] sm:$0xff]  ;;  %v1589_v11 = vld [vmem:[%s2750_s0 + $0x210] sm:$0xff]  ;;  %v1601_v46 = vmax.f32 %v67_v63, %v71_v50  ;;  %v1604_v44 = vmax.f32 %v68_v47, %v1569_v12  ;;  %v1659_v30 = vmax.f32 %v1498_v43, %v1553_v56 }
  0x1e   :  { %2905 = vst [vmem:[#allocation48_spill] sm:$0xff] %v1561_v40  ;;  %2906 = vst [vmem:[#allocation49_spill] sm:$0xff] %v1576_v60  ;;  %v1594_v7 = vld [vmem:[%s2750_s0 + $0x218] sm:$0xf]  ;;  %v1599_v26 = vld [vmem:[%s2750_s0 + $0x220] sm:$0xff]  ;;  %v1607_v0 = vmax.f32 %v69_v45, %v1574_v61  ;;  %v1623_v63 = vmax.f32 %v70_v16, %v1589_v11  ;;  %v1673_v20 = vmax.f32 %v1500_v22, %v1555_v37 }
  0x1f   :  { %2907 = vst [vmem:[#allocation50_spill] sm:$0xff] %v1578_v29  ;;  %2908 = vst [vmem:[#allocation51_spill] sm:$0xff] %v1580_v51  ;;  %v77_v10 = vld [vmem:[%s2750_s0 + $0x228] sm:$0xff]  ;;  %v78_v6 = vld [vmem:[%s2750_s0 + $0x230] sm:$0xff]  ;;  %v1626_v45 = vmax.f32 %v71_v50, %v1594_v7  ;;  %v1679_v56 = vmax.f32 %v1515_v57, %v1557_v24  ;;  %v1683_v25 = vmax.f32 %v1517_v58, %v1576_v60 }
  0x20   :  { %2909 = vst [vmem:[#allocation52_spill] sm:$0xff] %v1584_v17  ;;  %2910 = vst [vmem:[#allocation53_spill] sm:$0xff] %v1601_v46  ;;  %v79_v47 = vld [vmem:[%s2750_s0 + $0x238] sm:$0xf]  ;;  %v80_v9 = vld [vmem:[%s2750_s0 + $0x240] sm:$0xff]  ;;  %v1687_v43 = vmax.f32 %v1519_v31, %v1578_v29  ;;  %v1691_v42 = vmax.f32 %v1534_v34, %v1580_v51  ;;  %v1695_v37 = vmax.f32 %v1536_v27, %v1601_v46 }
  0x21   :  { %2911 = vst [vmem:[#allocation54_spill] sm:$0xff] %v1611_v18  ;;  %v81_v16 = vld [vmem:[%s2750_s0 + $0x248] sm:$0xff]  ;;  %v82_v50 = vld [vmem:[%s2750_s0 + $0x250] sm:$0xff]  ;;  %2912 = vst [vmem:[#allocation55_spill] sm:$0xff] %v1655_v35  ;;  %v1665_v8 = vmax.f32 %v1599_v26, %v80_v9  ;;  %v328_v46 = vmax.f32 %v1325_v41, %v1466_v15  ;;  %v329_v27 = vmax.f32 %v1343_v48, %v1485_v19 }
  0x22   :  { %2913 = vst [vmem:[#allocation56_spill] sm:$0xff] %v1659_v30  ;;  %v83_v5 = vld [vmem:[%s2750_s0 + $0x258] sm:$0xf]  ;;  %v1667_v28 = vmax.f32 %v77_v10, %v81_v16  ;;  %v1669_v36 = vmax.f32 %v78_v6, %v82_v50  ;;  %2917 = vst [vmem:[#allocation60_spill] sm:$0xff] %v1673_v20  ;;  %v2928_v48 = vmax.f32 %v1318_v38, %v1358_v54 }
  0x23   :  { %2914 = vst [vmem:[#allocation57_spill] sm:$0xff] %v1665_v8  ;;  %v1675_v49 = vmax.f32 %v79_v47, %v83_v5  ;;  %2919 = vst [vmem:[#allocation62_spill] sm:$0xff] %v1679_v56  ;;  %v1699_v24 = vmax.f32 %v1604_v44, %v1665_v8  ;;  %v330_v8 = vmax.f32 %v1361_v55, %v1504_v13 }
  0x24   :  { %2915 = vst [vmem:[#allocation58_spill] sm:$0xff] %v1667_v28  ;;  %2916 = vst [vmem:[#allocation59_spill] sm:$0xff] %v1669_v36  ;;  %v1703_v60 = vmax.f32 %v1607_v0, %v1667_v28  ;;  %v1707_v29 = vmax.f32 %v1623_v63, %v1669_v36  ;;  %v331_v28 = vmax.f32 %v1379_v62, %v1523_v2 }
  0x25   :  { %2918 = vst [vmem:[#allocation61_spill] sm:$0xff] %v1675_v49  ;;  %2920 = vst [vmem:[#allocation63_spill] sm:$0xff] %v1691_v42  ;;  %v1711_v51 = vmax.f32 %v1626_v45, %v1675_v49  ;;  %v2926_v36 = vmax.f32 %v1303_v32, %v1354_v52  ;;  %v2927_v49 = vmax.f32 %v1305_v33, %v1356_v53 }
  0x26   :  { %2921 = vst [vmem:[#allocation64_spill] sm:$0xff] %v1695_v37  ;;  %2922 = vst [vmem:[#allocation65_spill] sm:$0xff] %v1699_v24  ;;  %v342_v31 = vmax.f32 %v2928_v48, %v1584_v17  ;;  %v2929_v55 = vmax.f32 %v1320_v39, %v1372_v59  ;;  %v1739_v58 = vmax.f32 %v1630_v1, %v1683_v25 }
  0x27   :  { %2923 = vst [vmem:[#allocation66_spill] sm:$0xff] %v1703_v60  ;;  %2924 = vst [vmem:[#allocation67_spill] sm:$0xff] %v1707_v29  ;;  %v340_v34 = vmax.f32 %v2926_v36, %v1542_v3  ;;  %v341_v41 = vmax.f32 %v2927_v49, %v1561_v40  ;;  %v1743_v36 = vmax.f32 %v1634_v21, %v1687_v43 }
  0x28   :  { %2925 = vst [vmem:[#allocation68_spill] sm:$0xff] %v1711_v51  ;;  %v343_v62 = vmax.f32 %v2929_v55, %v1611_v18  ;;  %2930 = vst [vmem:[#allocation69_spill] sm:$0xff] %v1739_v58  ;;  %v1747_v49 = vmax.f32 %v1647_v14, %v1691_v42  ;;  %v1751_v48 = vmax.f32 %v1651_v23, %v1695_v37 }
  0x29   :  { %2931 = vst [vmem:[#allocation70_spill] sm:$0xff] %v1743_v36  ;;  %v1755_v17 = vmax.f32 %v1655_v35, %v1699_v24  ;;  %v1759_v55 = vmax.f32 %v1659_v30, %v1703_v60  ;;  %v1763_v18 = vmax.f32 %v1673_v20, %v1707_v29  ;;  %v1767_v40 = vmax.f32 %v1679_v56, %v1711_v51  ;;  %v1782_v29 = vld [vmem:[%s2750_s0 + $0x260] sm:$0xff]  ;;  %v2947_v56 = vld [vmem:[#allocation4_spill] sm:$0xff] }
  0x2a   :  { %2932 = vst [vmem:[#allocation71_spill] sm:$0xff] %v1747_v49  ;;  %2933 = vst [vmem:[#allocation72_spill] sm:$0xff] %v1751_v48  ;;  %v412_v3 = vmax.f32 %v328_v46, %v1739_v58  ;;  %v413_v37 = vmax.f32 %v329_v27, %v1743_v36  ;;  %v414_v42 = vmax.f32 %v330_v8, %v1747_v49  ;;  %v1787_v46 = vld [vmem:[%s2750_s0 + $0x268] sm:$0xff]  ;;  %v1803_v27 = vld [vmem:[%s2750_s0 + $0x278] sm:$0xf] }
  0x2b   :  { %2934 = vst [vmem:[#allocation73_spill] sm:$0xff] %v1755_v17  ;;  %2935 = vst [vmem:[#allocation74_spill] sm:$0xff] %v1759_v55  ;;  %v415_v24 = vmax.f32 %v331_v28, %v1751_v48  ;;  %v1774_v35 = vmax.f32 %v340_v34, %v1755_v17  ;;  %v1777_v60 = vmax.f32 %v341_v41, %v1759_v55  ;;  %v1798_v34 = vld [vmem:[%s2750_s0 + $0x270] sm:$0xff]  ;;  %v2945_v36 = vld [vmem:[#allocation7_spill] sm:$0xff] }
  0x2c   :  { %2936 = vst [vmem:[#allocation75_spill] sm:$0xff] %v1763_v18  ;;  %2937 = vst [vmem:[#allocation76_spill] sm:$0xff] %v1767_v40  ;;  %v1790_v8 = vmax.f32 %v342_v31, %v1763_v18  ;;  %v1793_v28 = vmax.f32 %v343_v62, %v1767_v40  ;;  %v1807_v41 = vmax.f32 %v1569_v12, %v1599_v26 }
  0x2d   :  { %v1810_v31 = vmax.f32 %v1574_v61, %v77_v10  ;;  %v464_v62 = vmax.f32 %v412_v3, %v1774_v35  ;;  %v465_v40 = vmax.f32 %v413_v37, %v1777_v60  ;;  %v1815_v18 = vmax.f32 %v1589_v11, %v78_v6 }
  0x2e   :  { %2938 = vst [vmem:[#allocation77_spill] sm:$0xff] %v1793_v28  ;;  %v1818_v55 = vmax.f32 %v1594_v7, %v79_v47  ;;  %v466_v17 = vmax.f32 %v414_v42, %v1790_v8  ;;  %v467_v48 = vmax.f32 %v415_v24, %v1793_v28  ;;  %v1823_v12 = vmax.f32 %v80_v9, %v1782_v29  ;;  %v2939_v42 = vld [vmem:[#allocation5_spill] sm:$0xff]  ;;  %v2941_v9 = vld [vmem:[#allocation2_spill] sm:$0xff] }
  0x2f   :  { %v1826_v10 = vmax.f32 %v81_v16, %v1787_v46  ;;  %v545_v61 = vrot.slane %v464_v62, 1  ;;  %v546_v3 = vrot.slane %v465_v40, 1  ;;  %v1829_v37 = vmax.f32 %v82_v50, %v1798_v34  ;;  %v2942_v47 = vld [vmem:[#allocation6_spill] sm:$0xff] }
  0x30   :  { %v1832_v6 = vmax.f32 %v83_v5, %v1803_v27  ;;  %v548_v7 = vrot.slane %v466_v17, 1  ;;  %v550_v11 = vrot.slane %v467_v48, 1  ;;  %v2940_v24 = vmax.f32 %v1217_v4, %v2939_v42  ;;  %v2944_v5 = vld [vmem:[#allocation3_spill] sm:$0xff]  ;;  %v2948_v4 = vld [vmem:[#allocation8_spill] sm:$0xff] }
  0x31   :  { %v2943_v16 = vmax.f32 %v2941_v9, %v2942_v47  ;;  %v547_v50 = vsel %vm544_vm0, %v545_v61, %v546_v3  ;;  %v2946_v58 = vmax.f32 %v2944_v5, %v2945_v36  ;;  %v2952_v5 = vld [vmem:[#allocation23_spill] sm:$0xff] }
  0x32   :  { %v1838_v26 = vmax.f32 %v2940_v24, %v1303_v32  ;;  %v2949_v32 = vmax.f32 %v2947_v56, %v2948_v4  ;;  %v2950_v24 = vld [vmem:[#allocation21_spill] sm:$0xff]  ;;  %v551_v61 = vsel %vm544_vm0, %v548_v7, %v550_v11  ;;  %v655_v47 = vmax.f32 %v464_v62, %v547_v50  ;;  %v2958_v50 = vld [vmem:[#allocation31_spill] sm:$0xff] }
  0x33   :  { %v1844_v49 = vmax.f32 %v2943_v16, %v1305_v33  ;;  %v1851_v51 = vmax.f32 %v2946_v58, %v1318_v38  ;;  %v1861_v9 = vmax.f32 %v1354_v52, %v2950_v24  ;;  %v549_v33 = vsel %vm544_vm0, %v546_v3, %v548_v7  ;;  %v2951_v38 = vld [vmem:[#allocation22_spill] sm:$0xff]  ;;  %v2953_v52 = vld [vmem:[#allocation24_spill] sm:$0xff]  ;;  %v2954_v3 = vld [vmem:[#allocation37_spill] sm:$0xff] }
  0x34   :  { %v1857_v42 = vmax.f32 %v2949_v32, %v1320_v39  ;;  %v658_v16 = vmax.f32 %v467_v48, %v550_v11  ;;  %v656_v20 = vmax.f32 %v465_v40, %v549_v33  ;;  %v657_v36 = vmax.f32 %v466_v17, %v551_v61  ;;  %v2955_v7 = vld [vmem:[#allocation29_spill] sm:$0xff]  ;;  %v2956_v48 = vld [vmem:[#allocation38_spill] sm:$0xff]  ;;  %v2959_v33 = vld [vmem:[#allocation32_spill] sm:$0xff] }
  0x35   :  { %v1867_v58 = vmax.f32 %v1356_v53, %v2951_v38  ;;  %v1871_v39 = vmax.f32 %v1358_v54, %v2952_v5  ;;  %v736_v56 = vrot.slane %v655_v47, 2  ;;  %v1875_v32 = vmax.f32 %v1372_v59, %v2953_v52  ;;  %v2957_v11 = vld [vmem:[#allocation30_spill] sm:$0xff]  ;;  %v2960_v59 = vld [vmem:[#allocation43_spill] sm:$0xff]  ;;  %v2961_v5 = vld [vmem:[#allocation45_spill] sm:$0xff] }
  0x36   :  { %v741_v4 = vrot.slane %v658_v16, 2  ;;  %v1879_v62 = vmax.f32 %v2955_v7, %v2954_v3  ;;  %v737_v40 = vrot.slane %v656_v20, 2  ;;  %v739_v17 = vrot.slane %v657_v36, 2 }
  0x37   :  { %v1883_v53 = vmax.f32 %v2957_v11, %v2956_v48  ;;  %v1887_v54 = vmax.f32 %v2958_v50, %v1500_v22  ;;  %v1891_v61 = vmax.f32 %v2959_v33, %v1515_v57  ;;  %v1895_v38 = vmax.f32 %v2960_v59, %v1604_v44  ;;  %v2963_v44 = vld [vmem:[#allocation47_spill] sm:$0xff] }
  0x38   :  { %v849_v24 = vmax.f32 %v658_v16, %v741_v4  ;;  %v1899_v52 = vmax.f32 %v2961_v5, %v1607_v0  ;;  %v738_v3 = vsel %vm735_vm1, %v736_v56, %v737_v40  ;;  %v740_v7 = vsel %vm735_vm1, %v737_v40, %v739_v17  ;;  %v2962_v16 = vld [vmem:[#allocation46_spill] sm:$0xff] }
  0x39   :  { %v742_v22 = vsel %vm735_vm1, %v739_v17, %v741_v4  ;;  %v1906_v48 = vmax.f32 %v2962_v16, %v1623_v63  ;;  %v846_v57 = vmax.f32 %v655_v47, %v738_v3  ;;  %v847_v11 = vmax.f32 %v656_v20, %v740_v7 }
  0x3a   :  { %v848_v50 = vmax.f32 %v657_v36, %v742_v22  ;;  %v932_v33 = vrot.slane %v849_v24, 4  ;;  %v1910_v59 = vmax.f32 %v2963_v44, %v1626_v45  ;;  %v1914_v0 = vmax.f32 %v1807_v41, %v1823_v12 }
  0x3b   :  { %v1918_v56 = vmax.f32 %v1810_v31, %v1826_v10  ;;  %v1922_v63 = vmax.f32 %v1815_v18, %v1829_v37  ;;  %v927_v20 = vrot.slane %v846_v57, 4  ;;  %v928_v47 = vrot.slane %v847_v11, 4 }
  0x3c   :  { %2964 = vst [vmem:[#allocation5_spill] sm:$0xff] %v1914_v0  ;;  %v930_v36 = vrot.slane %v848_v50, 4  ;;  %v1926_v4 = vmax.f32 %v1818_v55, %v1832_v6  ;;  %v332_v45 = vmax.f32 %v1838_v26, %v1861_v9  ;;  %v333_v40 = vmax.f32 %v1844_v49, %v1867_v58 }
  0x3d   :  { %2965 = vst [vmem:[#allocation2_spill] sm:$0xff] %v1918_v56  ;;  %2966 = vst [vmem:[#allocation6_spill] sm:$0xff] %v1922_v63  ;;  %v334_v17 = vmax.f32 %v1851_v51, %v1871_v39  ;;  %v335_v24 = vmax.f32 %v1857_v42, %v1875_v32  ;;  %v929_v5 = vsel %vm926_vm2, %v927_v20, %v928_v47 }
  0x3e   :  { %2967 = vst [vmem:[#allocation3_spill] sm:$0xff] %v1926_v4  ;;  %v931_v3 = vsel %vm926_vm2, %v928_v47, %v930_v36  ;;  %v933_v7 = vsel %vm926_vm2, %v930_v36, %v932_v33  ;;  %v344_v22 = vmax.f32 %v1466_v15, %v1630_v1  ;;  %v1027_v16 = vmax.f32 %v846_v57, %v929_v5 }
  0x3f   :  { %v1028_v26 = vmax.f32 %v847_v11, %v931_v3  ;;  %v1029_v44 = vmax.f32 %v848_v50, %v933_v7  ;;  %v345_v49 = vmax.f32 %v1485_v19, %v1634_v21  ;;  %v346_v51 = vmax.f32 %v1504_v13, %v1647_v14  ;;  %v2974_v21 = vld [vmem:[#allocation63_spill] sm:$0xff] }
  0x40   :  { %v347_v42 = vmax.f32 %v1523_v2, %v1651_v23  ;;  %v1949_v20 = vmax.f32 %v1879_v62, %v1895_v38  ;;  %v1953_v33 = vmax.f32 %v1883_v53, %v1899_v52  ;;  %v1957_v57 = vmax.f32 %v1887_v54, %v1906_v48  ;;  %v2976_v23 = vld [vmem:[#allocation64_spill] sm:$0xff] }
  0x41   :  { %v1057_v1 = vmax.f32 %v1027_v16, %v1028_v26  ;;  %v1058_v15 = vmax.f32 %v1028_v26, %v1029_v44  ;;  %v1961_v19 = vmax.f32 %v1891_v61, %v1910_v59  ;;  %v1965_v2 = vmax.f32 %v1683_v25, %v1914_v0  ;;  %v1984_v25 = vld [vmem:[%s2750_s0 + $0x280] sm:$0xff]  ;;  %v2014_v44 = vld [vmem:[%s2750_s0 + $0x298] sm:$0xf] }
  0x42   :  { %2968 = vst [vmem:[#allocation7_spill] sm:$0xff] %v1949_v20  ;;  %2969 = vst [vmem:[#allocation4_spill] sm:$0xff] %v1953_v33  ;;  %v1969_v13 = vmax.f32 %v1687_v43, %v1918_v56  ;;  %v1973_v14 = vmax.f32 %v2974_v21, %v1922_v63  ;;  %v1977_v11 = vmax.f32 %v2976_v23, %v1926_v4  ;;  %v2992_v4 = vld [vmem:[#allocation17_spill] sm:$0xff]  ;;  %v2993_v63 = vld [vmem:[#allocation26_spill] sm:$0xff] }
  0x43   :  { %2970 = vst [vmem:[#allocation8_spill] sm:$0xff] %v1957_v57  ;;  %2971 = vst [vmem:[#allocation21_spill] sm:$0xff] %v1961_v19  ;;  %v1098_v50 = vrot.slane %v1057_v1, 3  ;;  %v1099_v47 = vrot.slane %v1058_v15, 3  ;;  %v416_v36 = vmax.f32 %v332_v45, %v1949_v20  ;;  %v417_v5 = vmax.f32 %v333_v40, %v1953_v33  ;;  %v1997_v45 = vld [vmem:[%s2750_s0 + $0x288] sm:$0xff]  ;;  %v2002_v40 = vld [vmem:[%s2750_s0 + $0x290] sm:$0xff] }
  0x44   :  { %2972 = vst [vmem:[#allocation22_spill] sm:$0xff] %v1965_v2  ;;  %2973 = vst [vmem:[#allocation23_spill] sm:$0xff] %v1969_v13  ;;  %v418_v43 = vmax.f32 %v334_v17, %v1957_v57  ;;  %v419_v3 = vmax.f32 %v335_v24, %v1961_v19  ;;  %v1989_v7 = vmax.f32 %v344_v22, %v1965_v2  ;;  %v2990_v57 = vld [vmem:[#allocation12_spill] sm:$0xff]  ;;  %v2991_v20 = vld [vmem:[#allocation25_spill] sm:$0xff] }
  0x45   :  { %2975 = vst [vmem:[#allocation24_spill] sm:$0xff] %v1973_v14  ;;  %2977 = vst [vmem:[#allocation37_spill] sm:$0xff] %v1977_v11  ;;  %v1992_v16 = vmax.f32 %v345_v49, %v1969_v13  ;;  %v1100_v17 = vsel %vm1097_vm3, %v1098_v50, %v1099_v47  ;;  %v1149_v26 = vmax.f32 %v1058_v15, %v1099_v47  ;;  %v2988_v13 = vld [vmem:[#allocation11_spill] sm:$0xff]  ;;  %v2994_v56 = vld [vmem:[#allocation18_spill] sm:$0xff] }
  0x46   :  { %2978 = vst [vmem:[#allocation29_spill] sm:$0xff] %v1989_v7  ;;  %v2006_v24 = vmax.f32 %v346_v51, %v1973_v14  ;;  %v2009_v22 = vmax.f32 %v347_v42, %v1977_v11  ;;  %v1148_v49 = vmax.f32 %v1057_v1, %v1100_v17  ;;  %v468_v21 = vmax.f32 %v416_v36, %v1989_v7  ;;  %v2986_v11 = vld [vmem:[#allocation10_spill] sm:$0xff] }
  0x47   :  { %2979 = vst [vmem:[#allocation38_spill] sm:$0xff] %v1992_v16  ;;  %v469_v23 = vmax.f32 %v417_v5, %v1992_v16  ;;  %v2020_v50 = vmax.f32 %v1782_v29, %v1984_v25  ;;  %1169 = vst [vmem:[%s2751_s1 + $0x8] sm:$0x3] %v1149_v26  ;;  %v2029_v15 = vmax.f32 %v1787_v46, %v1997_v45  ;;  %v2983_v5 = vld [vmem:[#allocation13_spill] sm:$0xff]  ;;  %v2985_v26 = vld [vmem:[#allocation14_spill] sm:$0xff] }
  0x48   :  { %2980 = vst [vmem:[#allocation30_spill] sm:$0xff] %v2006_v24  ;;  %2981 = vst [vmem:[#allocation31_spill] sm:$0xff] %v2009_v22  ;;  %v470_v51 = vmax.f32 %v418_v43, %v2006_v24  ;;  %v471_v42 = vmax.f32 %v419_v3, %v2009_v22  ;;  %v2033_v1 = vmax.f32 %v1798_v34, %v2002_v40  ;;  %v552_v29 = vrot.slane %v468_v21, 1  ;;  %v2984_v43 = vld [vmem:[#allocation9_spill] sm:$0xff]  ;;  %v2987_v34 = vld [vmem:[#allocation15_spill] sm:$0xff] }
  0x49   :  { %1168 = vst [vmem:[%s2751_s1] sm:$0xff] %v1148_v49  ;;  %v553_v47 = vrot.slane %v469_v23, 1  ;;  %v2040_v36 = vmax.f32 %v1803_v27, %v2014_v44  ;;  %v236_v3 = vmax.f32 %v2984_v43, %v2983_v5  ;;  %v237_v14 = vmax.f32 %v2986_v11, %v2985_v26  ;;  %v2989_v49 = vld [vmem:[#allocation16_spill] sm:$0xff]  ;;  %v2996_v22 = vld [vmem:[#allocation19_spill] sm:$0xff] }
  0x4a   :  { %v555_v17 = vrot.slane %v470_v51, 1  ;;  %v557_v46 = vrot.slane %v471_v42, 1  ;;  %v238_v2 = vmax.f32 %v2988_v13, %v2987_v34  ;;  %v239_v33 = vmax.f32 %v2990_v57, %v2989_v49  ;;  %v2997_v57 = vld [vmem:[#allocation28_spill] sm:$0xff] }
  0x4b   :  { %2982 = vst [vmem:[#allocation32_spill] sm:$0xff] %v2040_v36  ;;  %v554_v19 = vsel %vm544_vm0, %v552_v29, %v553_v47  ;;  %v2053_v27 = vmax.f32 %v2992_v4, %v2991_v20  ;;  %v2057_v5 = vmax.f32 %v2994_v56, %v2993_v63  ;;  %v2995_v29 = vld [vmem:[#allocation27_spill] sm:$0xff]  ;;  %v2998_v49 = vld [vmem:[#allocation20_spill] sm:$0xff]  ;;  %v3000_v63 = vld [vmem:[#allocation33_spill] sm:$0xff] }
  0x4c   :  { %v556_v43 = vsel %vm544_vm0, %v553_v47, %v555_v17  ;;  %v558_v11 = vsel %vm544_vm0, %v555_v17, %v557_v46  ;;  %v659_v26 = vmax.f32 %v468_v21, %v554_v19  ;;  %v662_v0 = vmax.f32 %v471_v42, %v557_v46  ;;  %v2999_v56 = vld [vmem:[#allocation39_spill] sm:$0xff]  ;;  %v3001_v47 = vld [vmem:[#allocation40_spill] sm:$0xff]  ;;  %v3002_v17 = vld [vmem:[#allocation34_spill] sm:$0xff] }
  0x4d   :  { %v660_v13 = vmax.f32 %v469_v23, %v556_v43  ;;  %v661_v34 = vmax.f32 %v470_v51, %v558_v11  ;;  %v2063_v24 = vmax.f32 %v2996_v22, %v2995_v29  ;;  %v2067_v4 = vmax.f32 %v2998_v49, %v2997_v57  ;;  %v3003_v51 = vld [vmem:[#allocation41_spill] sm:$0xff]  ;;  %v3004_v42 = vld [vmem:[#allocation35_spill] sm:$0xff]  ;;  %v3005_v46 = vld [vmem:[#allocation42_spill] sm:$0xff] }
  0x4e   :  { %v743_v20 = vrot.slane %v659_v26, 2  ;;  %v748_v16 = vrot.slane %v662_v0, 2  ;;  %v2071_v7 = vmax.f32 %v3000_v63, %v2999_v56  ;;  %v2075_v19 = vmax.f32 %v3002_v17, %v3001_v47  ;;  %v3006_v43 = vld [vmem:[#allocation36_spill] sm:$0xff]  ;;  %v3007_v57 = vld [vmem:[#allocation49_spill] sm:$0xff]  ;;  %v3008_v56 = vld [vmem:[#allocation50_spill] sm:$0xff] }
  0x4f   :  { %v744_v21 = vrot.slane %v660_v13, 2  ;;  %v746_v23 = vrot.slane %v661_v34, 2  ;;  %v2079_v22 = vmax.f32 %v3004_v42, %v3003_v51  ;;  %v2083_v11 = vmax.f32 %v3006_v43, %v3005_v46  ;;  %v3009_v47 = vld [vmem:[#allocation51_spill] sm:$0xff] }
  0x50   :  { %v853_v29 = vmax.f32 %v662_v0, %v748_v16  ;;  %v2087_v49 = vmax.f32 %v3007_v57, %v1807_v41  ;;  %v2091_v63 = vmax.f32 %v3008_v56, %v1810_v31  ;;  %v2095_v17 = vmax.f32 %v3009_v47, %v1815_v18  ;;  %v3010_v0 = vld [vmem:[#allocation53_spill] sm:$0xff]  ;;  %v3012_v18 = vld [vmem:[#allocation58_spill] sm:$0xff] }
  0x51   :  { %v745_v51 = vsel %vm735_vm1, %v743_v20, %v744_v21  ;;  %v747_v42 = vsel %vm735_vm1, %v744_v21, %v746_v23  ;;  %v749_v46 = vsel %vm735_vm1, %v746_v23, %v748_v16  ;;  %v2102_v43 = vmax.f32 %v3010_v0, %v1818_v55  ;;  %v3011_v31 = vld [vmem:[#allocation57_spill] sm:$0xff]  ;;  %v3013_v20 = vld [vmem:[#allocation59_spill] sm:$0xff] }
  0x52   :  { %v850_v41 = vmax.f32 %v659_v26, %v745_v51  ;;  %v851_v57 = vmax.f32 %v660_v13, %v747_v42  ;;  %v852_v30 = vmax.f32 %v661_v34, %v749_v46  ;;  %v939_v28 = vrot.slane %v853_v29, 4  ;;  %v3014_v16 = vld [vmem:[#allocation61_spill] sm:$0xff] }
  0x53   :  { %v2106_v56 = vmax.f32 %v3011_v31, %v2020_v50  ;;  %v2110_v47 = vmax.f32 %v3012_v18, %v2029_v15  ;;  %v2114_v21 = vmax.f32 %v3013_v20, %v2033_v1  ;;  %v2118_v55 = vmax.f32 %v3014_v16, %v2040_v36 }
  0x54   :  { %v934_v26 = vrot.slane %v850_v41, 4  ;;  %v935_v13 = vrot.slane %v851_v57, 4  ;;  %v937_v34 = vrot.slane %v852_v30, 4  ;;  %v336_v23 = vmax.f32 %v236_v3, %v2053_v27 }
  0x55   :  { %v337_v29 = vmax.f32 %v237_v14, %v2057_v5  ;;  %v338_v51 = vmax.f32 %v238_v2, %v2063_v24  ;;  %v339_v42 = vmax.f32 %v239_v33, %v2067_v4  ;;  %v348_v46 = vmax.f32 %v1861_v9, %v1879_v62 }
  0x56   :  { %v936_v0 = vsel %vm926_vm2, %v934_v26, %v935_v13  ;;  %v938_v31 = vsel %vm926_vm2, %v935_v13, %v937_v34  ;;  %v940_v18 = vsel %vm926_vm2, %v937_v34, %v939_v28  ;;  %v349_v20 = vmax.f32 %v1867_v58, %v1883_v53 }
  0x57   :  { %v1030_v16 = vmax.f32 %v850_v41, %v936_v0  ;;  %v1031_v3 = vmax.f32 %v851_v57, %v938_v31  ;;  %v1032_v36 = vmax.f32 %v852_v30, %v940_v18  ;;  %v350_v2 = vmax.f32 %v1871_v39, %v1887_v54 }
  0x58   :  { %v351_v33 = vmax.f32 %v1875_v32, %v1891_v61  ;;  %v2137_v9 = vmax.f32 %v2071_v7, %v2087_v49  ;;  %v2141_v62 = vmax.f32 %v2075_v19, %v2091_v63  ;;  %v2145_v28 = vmax.f32 %v2079_v22, %v2095_v17 }
  0x59   :  { %v1059_v58 = vmax.f32 %v1030_v16, %v1031_v3  ;;  %v1060_v30 = vmax.f32 %v1031_v3, %v1032_v36  ;;  %v2149_v39 = vmax.f32 %v2083_v11, %v2102_v43  ;;  %v380_v32 = vmax.f32 %v1895_v38, %v2106_v56  ;;  %v92_v36 = vld [vmem:[%s2750_s0 + $0x2a0] sm:$0xff] }
  0x5a   :  { %v381_v53 = vmax.f32 %v1899_v52, %v2110_v47  ;;  %v382_v54 = vmax.f32 %v1906_v48, %v2114_v21  ;;  %v383_v61 = vmax.f32 %v1910_v59, %v2118_v55  ;;  %v420_v14 = vmax.f32 %v336_v23, %v2137_v9  ;;  %v2175_v59 = vld [vmem:[%s2750_s0 + $0x2a8] sm:$0xff]  ;;  %v2180_v23 = vld [vmem:[%s2750_s0 + $0x2b0] sm:$0xff] }
  0x5b   :  { %v1101_v41 = vrot.slane %v1059_v58, 3  ;;  %v1102_v57 = vrot.slane %v1060_v30, 3  ;;  %v421_v26 = vmax.f32 %v337_v29, %v2141_v62  ;;  %v422_v38 = vmax.f32 %v338_v51, %v2145_v28  ;;  %v2185_v29 = vld [vmem:[%s2750_s0 + $0x2b8] sm:$0xf] }
  0x5c   :  { %v423_v52 = vmax.f32 %v339_v42, %v2149_v39  ;;  %v2166_v13 = vmax.f32 %v348_v46, %v380_v32  ;;  %v2168_v48 = vmax.f32 %v349_v20, %v381_v53  ;;  %v2170_v34 = vmax.f32 %v350_v2, %v382_v54 }
  0x5d   :  { %v1103_v51 = vsel %vm1097_vm3, %v1101_v41, %v1102_v57  ;;  %v1151_v42 = vmax.f32 %v1060_v30, %v1102_v57  ;;  %v2188_v46 = vmax.f32 %v351_v33, %v383_v61  ;;  %v2191_v0 = vmax.f32 %v1984_v25, %v92_v36 }
  0x5e   :  { %v1150_v31 = vmax.f32 %v1059_v58, %v1103_v51  ;;  %v472_v18 = vmax.f32 %v420_v14, %v2166_v13  ;;  %v473_v20 = vmax.f32 %v421_v26, %v2168_v48  ;;  %v474_v16 = vmax.f32 %v422_v38, %v2170_v34 }
  0x5f   :  { %1171 = vst [vmem:[%s2751_s1 + $0x18] sm:$0x3] %v1151_v42  ;;  %v475_v3 = vmax.f32 %v423_v52, %v2188_v46  ;;  %v2202_v2 = vmax.f32 %v1997_v45, %v2175_v59  ;;  %v2206_v25 = vmax.f32 %v2002_v40, %v2180_v23  ;;  %v2210_v33 = vmax.f32 %v2014_v44, %v2185_v29 }
  0x60   :  { %1170 = vst [vmem:[%s2751_s1 + $0x10] sm:$0xff] %v1150_v31  ;;  %v559_v58 = vrot.slane %v472_v18, 1  ;;  %v560_v30 = vrot.slane %v473_v20, 1  ;;  %v562_v32 = vrot.slane %v474_v16, 1  ;;  %v2217_v53 = vmax.f32 %v1823_v12, %v2191_v0 }
  0x61   :  { %v564_v45 = vrot.slane %v475_v3, 1  ;;  %v2221_v40 = vmax.f32 %v1826_v10, %v2202_v2  ;;  %v2225_v44 = vmax.f32 %v1829_v37, %v2206_v25  ;;  %v2229_v54 = vmax.f32 %v1832_v6, %v2210_v33 }
  0x62   :  { %v561_v61 = vsel %vm544_vm0, %v559_v58, %v560_v30  ;;  %v563_v14 = vsel %vm544_vm0, %v560_v30, %v562_v32  ;;  %v352_v12 = vmax.f32 %v2053_v27, %v2071_v7  ;;  %v353_v41 = vmax.f32 %v2057_v5, %v2075_v19  ;;  %v2247_v7 = vld [vmem:[%s2750_s0 + $0x2c0] sm:$0xff] }
  0x63   :  { %v565_v10 = vsel %vm544_vm0, %v562_v32, %v564_v45  ;;  %v663_v57 = vmax.f32 %v472_v18, %v561_v61  ;;  %v664_v26 = vmax.f32 %v473_v20, %v563_v14  ;;  %v666_v37 = vmax.f32 %v475_v3, %v564_v45 }
  0x64   :  { %v665_v38 = vmax.f32 %v474_v16, %v565_v10  ;;  %v354_v6 = vmax.f32 %v2063_v24, %v2079_v22  ;;  %v355_v52 = vmax.f32 %v2067_v4, %v2083_v11  ;;  %v384_v51 = vmax.f32 %v2087_v49, %v2217_v53 }
  0x65   :  { %v750_v27 = vrot.slane %v663_v57, 2  ;;  %v751_v5 = vrot.slane %v664_v26, 2  ;;  %v755_v19 = vrot.slane %v666_v37, 2  ;;  %v385_v42 = vmax.f32 %v2091_v63, %v2221_v40 }
  0x66   :  { %v753_v31 = vrot.slane %v665_v38, 2  ;;  %v386_v24 = vmax.f32 %v2095_v17, %v2225_v44  ;;  %v387_v4 = vmax.f32 %v2102_v43, %v2229_v54  ;;  %v2255_v22 = vmax.f32 %v352_v12, %v384_v51  ;;  %v2270_v17 = vld [vmem:[%s2750_s0 + $0x2c8] sm:$0xff] }
  0x67   :  { %v752_v11 = vsel %vm735_vm1, %v750_v27, %v751_v5  ;;  %v857_v49 = vmax.f32 %v666_v37, %v755_v19  ;;  %v2258_v18 = vmax.f32 %v353_v41, %v385_v42  ;;  %v2261_v20 = vmax.f32 %v92_v36, %v2247_v7  ;;  %v2277_v36 = vld [vmem:[%s2750_s0 + $0x2d0] sm:$0xff] }
  0x68   :  { %v754_v16 = vsel %vm735_vm1, %v751_v5, %v753_v31  ;;  %v756_v63 = vsel %vm735_vm1, %v753_v31, %v755_v19  ;;  %v854_v3 = vmax.f32 %v663_v57, %v752_v11  ;;  %v2265_v58 = vmax.f32 %v354_v6, %v386_v24  ;;  %v99_v24 = vld [vmem:[%s2750_s0 + $0x2d8] sm:$0xf] }
  0x69   :  { %v855_v43 = vmax.f32 %v664_v26, %v754_v16  ;;  %v856_v30 = vmax.f32 %v665_v38, %v756_v63  ;;  %v946_v32 = vrot.slane %v857_v49, 4  ;;  %v2272_v45 = vmax.f32 %v355_v52, %v387_v4  ;;  %v3015_v26 = vld [vmem:[#allocation77_spill] sm:$0xff] }
  0x6a   :  { %v941_v61 = vrot.slane %v854_v3, 4  ;;  %v476_v14 = vmax.f32 %v1774_v35, %v2255_v22  ;;  %v477_v12 = vmax.f32 %v1777_v60, %v2258_v18  ;;  %v478_v41 = vmax.f32 %v1790_v8, %v2265_v58 }
  0x6b   :  { %v942_v10 = vrot.slane %v855_v43, 4  ;;  %v944_v57 = vrot.slane %v856_v30, 4  ;;  %v479_v37 = vmax.f32 %v3015_v26, %v2272_v45  ;;  %v2289_v38 = vmax.f32 %v2175_v59, %v2270_v17 }
  0x6c   :  { %v566_v6 = vrot.slane %v476_v14, 1  ;;  %v567_v52 = vrot.slane %v477_v12, 1  ;;  %v569_v51 = vrot.slane %v478_v41, 1  ;;  %v2293_v35 = vmax.f32 %v2180_v23, %v2277_v36 }
  0x6d   :  { %v943_v60 = vsel %vm926_vm2, %v941_v61, %v942_v10  ;;  %v945_v8 = vsel %vm926_vm2, %v942_v10, %v944_v57  ;;  %v947_v27 = vsel %vm926_vm2, %v944_v57, %v946_v32  ;;  %v571_v5 = vrot.slane %v479_v37, 1 }
  0x6e   :  { %v1033_v19 = vmax.f32 %v854_v3, %v943_v60  ;;  %v1034_v42 = vmax.f32 %v855_v43, %v945_v8  ;;  %v1035_v31 = vmax.f32 %v856_v30, %v947_v27  ;;  %v568_v59 = vsel %vm544_vm0, %v566_v6, %v567_v52 }
  0x6f   :  { %v570_v4 = vsel %vm544_vm0, %v567_v52, %v569_v51  ;;  %v572_v23 = vsel %vm544_vm0, %v569_v51, %v571_v5  ;;  %v667_v11 = vmax.f32 %v476_v14, %v568_v59  ;;  %v670_v49 = vmax.f32 %v479_v37, %v571_v5  ;;  %v3022_v59 = vld [vmem:[#allocation44_spill] sm:$0xff] }
  0x70   :  { %v1061_v16 = vmax.f32 %v1033_v19, %v1034_v42  ;;  %v1062_v63 = vmax.f32 %v1034_v42, %v1035_v31  ;;  %v668_v61 = vmax.f32 %v477_v12, %v570_v4  ;;  %v669_v32 = vmax.f32 %v478_v41, %v572_v23  ;;  %v3021_v31 = vld [vmem:[#allocation55_spill] sm:$0xff]  ;;  %v3023_v23 = vld [vmem:[#allocation56_spill] sm:$0xff] }
  0x71   :  { %v757_v10 = vrot.slane %v667_v11, 2  ;;  %v762_v3 = vrot.slane %v670_v49, 2  ;;  %v2305_v43 = vmax.f32 %v2185_v29, %v99_v24  ;;  %v2309_v30 = vmax.f32 %v2020_v50, %v2261_v20  ;;  %v3019_v29 = vld [vmem:[#allocation32_spill] sm:$0xff] }
  0x72   :  { %v1104_v57 = vrot.slane %v1061_v16, 3  ;;  %v1105_v26 = vrot.slane %v1062_v63, 3  ;;  %v758_v6 = vrot.slane %v668_v61, 2  ;;  %v760_v52 = vrot.slane %v669_v32, 2 }
  0x73   :  { %3016 = vst [vmem:[#allocation43_spill] sm:$0xff] %v2309_v30  ;;  %v861_v51 = vmax.f32 %v670_v49, %v762_v3  ;;  %v2313_v14 = vmax.f32 %v2029_v15, %v2289_v38  ;;  %v2317_v12 = vmax.f32 %v2033_v1, %v2293_v35  ;;  %v2321_v41 = vmax.f32 %v3019_v29, %v2305_v43  ;;  %v3024_v49 = vld [vmem:[#allocation48_spill] sm:$0xff]  ;;  %v3029_v29 = vld [vmem:[#allocation65_spill] sm:$0xff] }
  0x74   :  { %v1106_v50 = vsel %vm1097_vm3, %v1104_v57, %v1105_v26  ;;  %v1153_v37 = vmax.f32 %v1062_v63, %v1105_v26  ;;  %v759_v60 = vsel %vm735_vm1, %v757_v10, %v758_v6  ;;  %v761_v8 = vsel %vm735_vm1, %v758_v6, %v760_v52  ;;  %v3025_v10 = vld [vmem:[#allocation60_spill] sm:$0xff]  ;;  %v3027_v26 = vld [vmem:[#allocation62_spill] sm:$0xff] }
  0x75   :  { %3017 = vst [vmem:[#allocation45_spill] sm:$0xff] %v2313_v14  ;;  %3018 = vst [vmem:[#allocation46_spill] sm:$0xff] %v2317_v12  ;;  %v1152_v27 = vmax.f32 %v1061_v16, %v1106_v50  ;;  %v763_v5 = vsel %vm735_vm1, %v760_v52, %v762_v3  ;;  %v858_v15 = vmax.f32 %v667_v11, %v759_v60  ;;  %v953_v42 = vrot.slane %v861_v51, 4  ;;  %v2337_v16 = vld [vmem:[%s2750_s0 + $0x2e0] sm:$0xff]  ;;  %v2342_v11 = vld [vmem:[%s2750_s0 + $0x2e8] sm:$0xff] }
  0x76   :  { %3020 = vst [vmem:[#allocation47_spill] sm:$0xff] %v2321_v41  ;;  %v859_v19 = vmax.f32 %v668_v61, %v761_v8  ;;  %1173 = vst [vmem:[%s2751_s1 + $0x28] sm:$0x3] %v1153_v37  ;;  %v860_v1 = vmax.f32 %v669_v32, %v763_v5  ;;  %v356_v4 = vmax.f32 %v3022_v59, %v3021_v31  ;;  %v3026_v3 = vld [vmem:[#allocation52_spill] sm:$0xff]  ;;  %v3028_v6 = vld [vmem:[#allocation54_spill] sm:$0xff] }
  0x77   :  { %v357_v63 = vmax.f32 %v3024_v49, %v3023_v23  ;;  %1172 = vst [vmem:[%s2751_s1 + $0x20] sm:$0xff] %v1152_v27  ;;  %v948_v61 = vrot.slane %v858_v15, 4  ;;  %v358_v57 = vmax.f32 %v3026_v3, %v3025_v10  ;;  %v359_v52 = vmax.f32 %v3028_v6, %v3027_v26  ;;  %v3030_v37 = vld [vmem:[#allocation66_spill] sm:$0xff]  ;;  %v3031_v8 = vld [vmem:[#allocation67_spill] sm:$0xff]  ;;  %v3032_v31 = vld [vmem:[#allocation68_spill] sm:$0xff] }
  0x78   :  { %v949_v32 = vrot.slane %v859_v19, 4  ;;  %v951_v51 = vrot.slane %v860_v1, 4  ;;  %v388_v50 = vmax.f32 %v3029_v29, %v2309_v30  ;;  %v389_v60 = vmax.f32 %v3030_v37, %v2313_v14  ;;  %v2363_v23 = vld [vmem:[%s2750_s0 + $0x2f0] sm:$0xff]  ;;  %v2368_v49 = vld [vmem:[%s2750_s0 + $0x2f8] sm:$0xf] }
  0x79   :  { %v390_v5 = vmax.f32 %v3031_v8, %v2317_v12  ;;  %v391_v59 = vmax.f32 %v3032_v31, %v2321_v41  ;;  %v2372_v10 = vmax.f32 %v2247_v7, %v2337_v16  ;;  %v3035_v7 = vld [vmem:[#allocation29_spill] sm:$0xff] }
  0x7a   :  { %v950_v27 = vsel %vm926_vm2, %v948_v61, %v949_v32  ;;  %v2376_v61 = vmax.f32 %v2270_v17, %v2342_v11  ;;  %v952_v3 = vsel %vm926_vm2, %v949_v32, %v951_v51  ;;  %v954_v26 = vsel %vm926_vm2, %v951_v51, %v953_v42 }
  0x7b   :  { %v1036_v6 = vmax.f32 %v858_v15, %v950_v27  ;;  %v2380_v29 = vmax.f32 %v356_v4, %v388_v50  ;;  %v1037_v37 = vmax.f32 %v859_v19, %v952_v3  ;;  %v1038_v8 = vmax.f32 %v860_v1, %v954_v26  ;;  %v3036_v19 = vld [vmem:[#allocation38_spill] sm:$0xff] }
  0x7c   :  { %v2382_v31 = vmax.f32 %v357_v63, %v389_v60  ;;  %v2384_v41 = vmax.f32 %v358_v57, %v390_v5  ;;  %v2386_v12 = vmax.f32 %v359_v52, %v391_v59  ;;  %v2392_v17 = vmax.f32 %v2277_v36, %v2363_v23  ;;  %v3037_v63 = vld [vmem:[#allocation30_spill] sm:$0xff]  ;;  %v3038_v57 = vld [vmem:[#allocation31_spill] sm:$0xff] }
  0x7d   :  { %v480_v14 = vmax.f32 %v3035_v7, %v2380_v29  ;;  %v2395_v42 = vmax.f32 %v99_v24, %v2368_v49  ;;  %v1063_v15 = vmax.f32 %v1036_v6, %v1037_v37  ;;  %v1064_v4 = vmax.f32 %v1037_v37, %v1038_v8 }
  0x7e   :  { %3033 = vst [vmem:[#allocation63_spill] sm:$0xff] %v2384_v41  ;;  %3034 = vst [vmem:[#allocation64_spill] sm:$0xff] %v2386_v12  ;;  %v481_v1 = vmax.f32 %v3036_v19, %v2382_v31  ;;  %v482_v32 = vmax.f32 %v3037_v63, %v2384_v41  ;;  %v483_v52 = vmax.f32 %v3038_v57, %v2386_v12 }
  0x7f   :  { %v573_v51 = vrot.slane %v480_v14, 1  ;;  %v2405_v50 = vmax.f32 %v2191_v0, %v2372_v10  ;;  %v2409_v36 = vmax.f32 %v2202_v2, %v2376_v61  ;;  %v1107_v24 = vrot.slane %v1063_v15, 3  ;;  %v3043_v0 = vld [vmem:[#allocation5_spill] sm:$0xff] }
  0x80   :  { %v1108_v60 = vrot.slane %v1064_v4, 3  ;;  %v574_v5 = vrot.slane %v481_v1, 1  ;;  %v576_v27 = vrot.slane %v482_v32, 1  ;;  %v578_v59 = vrot.slane %v483_v52, 1 }
  0x81   :  { %3039 = vst [vmem:[#allocation13_spill] sm:$0xff] %v2405_v50  ;;  %3040 = vst [vmem:[#allocation9_spill] sm:$0xff] %v2409_v36  ;;  %v2413_v3 = vmax.f32 %v2206_v25, %v2392_v17  ;;  %v2417_v26 = vmax.f32 %v2210_v33, %v2395_v42  ;;  %v392_v6 = vmax.f32 %v3043_v0, %v2405_v50  ;;  %v3044_v0 = vld [vmem:[#allocation2_spill] sm:$0xff] }
  0x82   :  { %v1109_v37 = vsel %vm1097_vm3, %v1107_v24, %v1108_v60  ;;  %v1155_v2 = vmax.f32 %v1064_v4, %v1108_v60  ;;  %v575_v8 = vsel %vm544_vm0, %v573_v51, %v574_v5  ;;  %v577_v7 = vsel %vm544_vm0, %v574_v5, %v576_v27  ;;  %v3045_v4 = vld [vmem:[#allocation6_spill] sm:$0xff]  ;;  %v3047_v51 = vld [vmem:[#allocation69_spill] sm:$0xff] }
  0x83   :  { %3041 = vst [vmem:[#allocation14_spill] sm:$0xff] %v2413_v3  ;;  %3042 = vst [vmem:[#allocation10_spill] sm:$0xff] %v2417_v26  ;;  %v1154_v19 = vmax.f32 %v1063_v15, %v1109_v37  ;;  %v579_v63 = vsel %vm544_vm0, %v576_v27, %v578_v59  ;;  %v671_v57 = vmax.f32 %v480_v14, %v575_v8  ;;  %v2435_v15 = vld [vmem:[%s2750_s0 + $0x300] sm:$0xff] }
  0x84   :  { %v672_v25 = vmax.f32 %v481_v1, %v577_v7  ;;  %1175 = vst [vmem:[%s2751_s1 + $0x38] sm:$0x3] %v1155_v2  ;;  %v673_v33 = vmax.f32 %v482_v32, %v579_v63  ;;  %v674_v30 = vmax.f32 %v483_v52, %v578_v59  ;;  %v393_v50 = vmax.f32 %v3044_v0, %v2409_v36  ;;  %v3046_v32 = vld [vmem:[#allocation3_spill] sm:$0xff]  ;;  %v3049_v59 = vld [vmem:[#allocation70_spill] sm:$0xff]  ;;  %v3053_v63 = vld [vmem:[#allocation72_spill] sm:$0xff] }
  0x85   :  { %v394_v24 = vmax.f32 %v3045_v4, %v2413_v3  ;;  %1174 = vst [vmem:[%s2751_s1 + $0x30] sm:$0xff] %v1154_v19  ;;  %v764_v14 = vrot.slane %v671_v57, 2  ;;  %v395_v52 = vmax.f32 %v3046_v32, %v2417_v26  ;;  %v2443_v60 = vmax.f32 %v3047_v51, %v392_v6  ;;  %v3051_v2 = vld [vmem:[#allocation71_spill] sm:$0xff] }
  0x86   :  { %v765_v1 = vrot.slane %v672_v25, 2  ;;  %v767_v5 = vrot.slane %v673_v33, 2  ;;  %v769_v27 = vrot.slane %v674_v30, 2  ;;  %v2446_v37 = vmax.f32 %v3049_v59, %v393_v50 }
  0x87   :  { %3048 = vst [vmem:[#allocation15_spill] sm:$0xff] %v2443_v60  ;;  %v2449_v8 = vmax.f32 %v3051_v2, %v394_v24  ;;  %v2453_v19 = vmax.f32 %v3053_v63, %v395_v52  ;;  %v484_v0 = vmax.f32 %v2166_v13, %v2443_v60  ;;  %v2459_v6 = vmax.f32 %v2337_v16, %v2435_v15  ;;  %v2470_v13 = vld [vmem:[%s2750_s0 + $0x308] sm:$0xff]  ;;  %v2475_v16 = vld [vmem:[%s2750_s0 + $0x310] sm:$0xff] }
  0x88   :  { %3050 = vst [vmem:[#allocation11_spill] sm:$0xff] %v2446_v37  ;;  %v766_v7 = vsel %vm735_vm1, %v764_v14, %v765_v1  ;;  %v768_v4 = vsel %vm735_vm1, %v765_v1, %v767_v5  ;;  %v770_v50 = vsel %vm735_vm1, %v767_v5, %v769_v27  ;;  %v865_v51 = vmax.f32 %v674_v30, %v769_v27  ;;  %v2480_v30 = vld [vmem:[%s2750_s0 + $0x318] sm:$0xf] }
  0x89   :  { %3052 = vst [vmem:[#allocation16_spill] sm:$0xff] %v2449_v8  ;;  %3054 = vst [vmem:[#allocation12_spill] sm:$0xff] %v2453_v19  ;;  %v862_v32 = vmax.f32 %v671_v57, %v766_v7  ;;  %v863_v24 = vmax.f32 %v672_v25, %v768_v4  ;;  %v864_v59 = vmax.f32 %v673_v33, %v770_v50  ;;  %v580_v25 = vrot.slane %v484_v0, 1 }
  0x8a   :  { %v485_v14 = vmax.f32 %v2168_v48, %v2446_v37  ;;  %v486_v52 = vmax.f32 %v2170_v34, %v2449_v8  ;;  %v960_v48 = vrot.slane %v865_v51, 4  ;;  %v487_v34 = vmax.f32 %v2188_v46, %v2453_v19 }
  0x8b   :  { %v955_v57 = vrot.slane %v862_v32, 4  ;;  %v956_v33 = vrot.slane %v863_v24, 4  ;;  %v958_v1 = vrot.slane %v864_v59, 4  ;;  %v2486_v7 = vmax.f32 %v2342_v11, %v2470_v13 }
  0x8c   :  { %v581_v5 = vrot.slane %v485_v14, 1  ;;  %v583_v27 = vrot.slane %v486_v52, 1  ;;  %v585_v2 = vrot.slane %v487_v34, 1  ;;  %v2490_v63 = vmax.f32 %v2363_v23, %v2475_v16 }
  0x8d   :  { %v2494_v4 = vmax.f32 %v2368_v49, %v2480_v30  ;;  %v957_v46 = vsel %vm926_vm2, %v955_v57, %v956_v33  ;;  %v959_v50 = vsel %vm926_vm2, %v956_v33, %v958_v1  ;;  %v961_v51 = vsel %vm926_vm2, %v958_v1, %v960_v48 }
  0x8e   :  { %v582_v26 = vsel %vm544_vm0, %v580_v25, %v581_v5  ;;  %v1039_v3 = vmax.f32 %v862_v32, %v957_v46  ;;  %v1040_v36 = vmax.f32 %v863_v24, %v959_v50  ;;  %v1041_v11 = vmax.f32 %v864_v59, %v961_v51  ;;  %v3055_v46 = vld [vmem:[#allocation7_spill] sm:$0xff]  ;;  %v3056_v51 = vld [vmem:[#allocation4_spill] sm:$0xff] }
  0x8f   :  { %v584_v19 = vsel %vm544_vm0, %v581_v5, %v583_v27  ;;  %v586_v23 = vsel %vm544_vm0, %v583_v27, %v585_v2  ;;  %v675_v8 = vmax.f32 %v484_v0, %v582_v26  ;;  %v678_v60 = vmax.f32 %v487_v34, %v585_v2 }
  0x90   :  { %v676_v37 = vmax.f32 %v485_v14, %v584_v19  ;;  %v1065_v49 = vmax.f32 %v1039_v3, %v1040_v36  ;;  %v1066_v12 = vmax.f32 %v1040_v36, %v1041_v11  ;;  %v677_v41 = vmax.f32 %v486_v52, %v586_v23  ;;  %v3057_v23 = vld [vmem:[#allocation8_spill] sm:$0xff] }
  0x91   :  { %v312_v57 = vmax.f32 %v2261_v20, %v2459_v6  ;;  %v771_v33 = vrot.slane %v675_v8, 2  ;;  %v776_v1 = vrot.slane %v678_v60, 2  ;;  %v313_v32 = vmax.f32 %v2289_v38, %v2486_v7 }
  0x92   :  { %v772_v48 = vrot.slane %v676_v37, 2  ;;  %v1110_v24 = vrot.slane %v1065_v49, 3  ;;  %v1111_v59 = vrot.slane %v1066_v12, 3  ;;  %v774_v25 = vrot.slane %v677_v41, 2 }
  0x93   :  { %v314_v26 = vmax.f32 %v2293_v35, %v2490_v63  ;;  %v869_v3 = vmax.f32 %v678_v60, %v776_v1  ;;  %v315_v36 = vmax.f32 %v2305_v43, %v2494_v4  ;;  %v396_v20 = vmax.f32 %v2106_v56, %v312_v57  ;;  %v2518_v35 = vld [vmem:[%s2750_s0 + $0x320] sm:$0xff] }
  0x94   :  { %v773_v19 = vsel %vm735_vm1, %v771_v33, %v772_v48  ;;  %v1112_v0 = vsel %vm1097_vm3, %v1110_v24, %v1111_v59  ;;  %v1157_v14 = vmax.f32 %v1066_v12, %v1111_v59  ;;  %v775_v52 = vsel %vm735_vm1, %v772_v48, %v774_v25  ;;  %v2558_v24 = vld [vmem:[%s2750_s0 + $0x330] sm:$0xff] }
  0x95   :  { %v777_v38 = vsel %vm735_vm1, %v774_v25, %v776_v1  ;;  %v1156_v34 = vmax.f32 %v1065_v49, %v1112_v0  ;;  %v866_v5 = vmax.f32 %v675_v8, %v773_v19  ;;  %v867_v27 = vmax.f32 %v676_v37, %v775_v52  ;;  %v2565_v19 = vld [vmem:[%s2750_s0 + $0x338] sm:$0xf] }
  0x96   :  { %v868_v2 = vmax.f32 %v677_v41, %v777_v38  ;;  %1177 = vst [vmem:[%s2751_s1 + $0x48] sm:$0x3] %v1157_v14  ;;  %v967_v56 = vrot.slane %v869_v3, 4  ;;  %v397_v43 = vmax.f32 %v2110_v47, %v313_v32  ;;  %v398_v12 = vmax.f32 %v2114_v21, %v314_v26  ;;  %v3058_v47 = vld [vmem:[#allocation21_spill] sm:$0xff] }
  0x97   :  { %v399_v60 = vmax.f32 %v2118_v55, %v315_v36  ;;  %1176 = vst [vmem:[%s2751_s1 + $0x40] sm:$0xff] %v1156_v34  ;;  %v962_v41 = vrot.slane %v866_v5, 4  ;;  %v963_v37 = vrot.slane %v867_v27, 4  ;;  %v2530_v50 = vmax.f32 %v3055_v46, %v396_v20  ;;  %v2544_v55 = vld [vmem:[%s2750_s0 + $0x328] sm:$0xff] }
  0x98   :  { %v965_v8 = vrot.slane %v868_v2, 4  ;;  %v2533_v11 = vmax.f32 %v3056_v51, %v397_v43  ;;  %v2536_v49 = vmax.f32 %v3057_v23, %v398_v12  ;;  %v2548_v57 = vmax.f32 %v2435_v15, %v2518_v35 }
  0x99   :  { %v2539_v21 = vmax.f32 %v3058_v47, %v399_v60  ;;  %v964_v33 = vsel %vm926_vm2, %v962_v41, %v963_v37  ;;  %v488_v32 = vmax.f32 %v2255_v22, %v2530_v50  ;;  %v2573_v20 = vmax.f32 %v2470_v13, %v2544_v55 }
  0x9a   :  { %v966_v48 = vsel %vm926_vm2, %v963_v37, %v965_v8  ;;  %v968_v1 = vsel %vm926_vm2, %v965_v8, %v967_v56  ;;  %v1042_v59 = vmax.f32 %v866_v5, %v964_v33  ;;  %v489_v15 = vmax.f32 %v2258_v18, %v2533_v11 }
  0x9b   :  { %v1043_v25 = vmax.f32 %v867_v27, %v966_v48  ;;  %v1044_v26 = vmax.f32 %v868_v2, %v968_v1  ;;  %v490_v3 = vmax.f32 %v2265_v58, %v2536_v49  ;;  %v491_v22 = vmax.f32 %v2272_v45, %v2539_v21 }
  0x9c   :  { %v587_v36 = vrot.slane %v488_v32, 1  ;;  %v588_v52 = vrot.slane %v489_v15, 1  ;;  %v2577_v18 = vmax.f32 %v2475_v16, %v2558_v24  ;;  %v2581_v58 = vmax.f32 %v2480_v30, %v2565_v19 }
  0x9d   :  { %v1067_v0 = vmax.f32 %v1042_v59, %v1043_v25  ;;  %v1068_v14 = vmax.f32 %v1043_v25, %v1044_v26  ;;  %v590_v38 = vrot.slane %v490_v3, 1  ;;  %v592_v34 = vrot.slane %v491_v22, 1 }
  0x9e   :  { %v316_v45 = vmax.f32 %v2372_v10, %v2548_v57  ;;  %v589_v13 = vsel %vm544_vm0, %v587_v36, %v588_v52  ;;  %v317_v2 = vmax.f32 %v2376_v61, %v2573_v20  ;;  %v2594_v10 = vld [vmem:[%s2750_s0 + $0x340] sm:$0xff]  ;;  %v318_v61 = vmax.f32 %v2392_v17, %v2577_v18 }
  0x9f   :  { %v1113_v5 = vrot.slane %v1067_v0, 3  ;;  %v1114_v27 = vrot.slane %v1068_v14, 3  ;;  %v591_v56 = vsel %vm544_vm0, %v588_v52, %v590_v38  ;;  %v593_v16 = vsel %vm544_vm0, %v590_v38, %v592_v34 }
  0xa0   :  { %v679_v43 = vmax.f32 %v488_v32, %v589_v13  ;;  %v682_v12 = vmax.f32 %v491_v22, %v592_v34  ;;  %v680_v41 = vmax.f32 %v489_v15, %v591_v56  ;;  %v681_v37 = vmax.f32 %v490_v3, %v593_v16  ;;  %v2618_v15 = vld [vmem:[%s2750_s0 + $0x348] sm:$0xff] }
  0xa1   :  { %v1115_v60 = vsel %vm1097_vm3, %v1113_v5, %v1114_v27  ;;  %v1159_v30 = vmax.f32 %v1068_v14, %v1114_v27  ;;  %v319_v33 = vmax.f32 %v2395_v42, %v2581_v58  ;;  %v400_v48 = vmax.f32 %v2217_v53, %v316_v45 }
  0xa2   :  { %v1158_v8 = vmax.f32 %v1067_v0, %v1115_v60  ;;  %v778_v46 = vrot.slane %v679_v43, 2  ;;  %v783_v51 = vrot.slane %v682_v12, 2  ;;  %v779_v23 = vrot.slane %v680_v41, 2 }
  0xa3   :  { %1179 = vst [vmem:[%s2751_s1 + $0x58] sm:$0x3] %v1159_v30  ;;  %v781_v47 = vrot.slane %v681_v37, 2  ;;  %v401_v32 = vmax.f32 %v2221_v40, %v317_v2  ;;  %v402_v17 = vmax.f32 %v2225_v44, %v318_v61  ;;  %v220_v59 = vmax.f32 %v2518_v35, %v2594_v10 }
  0xa4   :  { %1178 = vst [vmem:[%s2751_s1 + $0x50] sm:$0xff] %v1158_v8  ;;  %v873_v1 = vmax.f32 %v682_v12, %v783_v51  ;;  %v780_v25 = vsel %vm735_vm1, %v778_v46, %v779_v23  ;;  %v403_v53 = vmax.f32 %v2229_v54, %v319_v33  ;;  %v452_v36 = vmax.f32 %v2137_v9, %v400_v48  ;;  %v2627_v54 = vld [vmem:[%s2750_s0 + $0x350] sm:$0xff] }
  0xa5   :  { %v782_v26 = vsel %vm735_vm1, %v779_v23, %v781_v47  ;;  %v784_v42 = vsel %vm735_vm1, %v781_v47, %v783_v51  ;;  %v870_v3 = vmax.f32 %v679_v43, %v780_v25  ;;  %v453_v35 = vmax.f32 %v2141_v62, %v401_v32  ;;  %v3059_v62 = vld [vmem:[#allocation63_spill] sm:$0xff] }
  0xa6   :  { %v871_v40 = vmax.f32 %v680_v41, %v782_v26  ;;  %v872_v22 = vmax.f32 %v681_v37, %v784_v42  ;;  %v974_v44 = vrot.slane %v873_v1, 4  ;;  %v454_v0 = vmax.f32 %v2145_v28, %v402_v17  ;;  %v3060_v28 = vld [vmem:[#allocation64_spill] sm:$0xff] }
  0xa7   :  { %v455_v14 = vmax.f32 %v2149_v39, %v403_v53  ;;  %v969_v52 = vrot.slane %v870_v3, 4  ;;  %v221_v45 = vmax.f32 %v2544_v55, %v2618_v15  ;;  %v492_v5 = vmax.f32 %v2380_v29, %v452_v36  ;;  %v2638_v39 = vld [vmem:[%s2750_s0 + $0x358] sm:$0xf] }
  0xa8   :  { %v970_v38 = vrot.slane %v871_v40, 4  ;;  %v972_v34 = vrot.slane %v872_v22, 4  ;;  %v493_v9 = vmax.f32 %v2382_v31, %v453_v35  ;;  %v494_v27 = vmax.f32 %v3059_v62, %v454_v0  ;;  %v3062_v0 = vld [vmem:[#allocation45_spill] sm:$0xff] }
  0xa9   :  { %v495_v13 = vmax.f32 %v3060_v28, %v455_v14  ;;  %v222_v29 = vmax.f32 %v2558_v24, %v2627_v54  ;;  %v594_v12 = vrot.slane %v492_v5, 1  ;;  %v223_v37 = vmax.f32 %v2565_v19, %v2638_v39  ;;  %v3063_v14 = vld [vmem:[#allocation46_spill] sm:$0xff] }
  0xaa   :  { %v971_v2 = vsel %vm926_vm2, %v969_v52, %v970_v38  ;;  %v973_v56 = vsel %vm926_vm2, %v970_v38, %v972_v34  ;;  %v975_v16 = vsel %vm926_vm2, %v972_v34, %v974_v44  ;;  %v595_v60 = vrot.slane %v493_v9, 1  ;;  %v3061_v44 = vld [vmem:[#allocation43_spill] sm:$0xff]  ;;  %v116_v34 = vld [vmem:[%s2750_s0 + $0x360] sm:$0xff] }
  0xab   :  { %v1045_v55 = vmax.f32 %v870_v3, %v971_v2  ;;  %v1046_v31 = vmax.f32 %v871_v40, %v973_v56  ;;  %v1047_v43 = vmax.f32 %v872_v22, %v975_v16  ;;  %v597_v30 = vrot.slane %v494_v27, 1  ;;  %v3064_v52 = vld [vmem:[#allocation47_spill] sm:$0xff]  ;;  %v3066_v56 = vld [vmem:[#allocation74_spill] sm:$0xff] }
  0xac   :  { %v599_v41 = vrot.slane %v495_v13, 1  ;;  %v320_v51 = vmax.f32 %v2459_v6, %v220_v59  ;;  %v321_v61 = vmax.f32 %v2486_v7, %v221_v45  ;;  %v596_v23 = vsel %vm544_vm0, %v594_v12, %v595_v60 }
  0xad   :  { %v1069_v8 = vmax.f32 %v1045_v55, %v1046_v31  ;;  %v1070_v46 = vmax.f32 %v1046_v31, %v1047_v43  ;;  %v598_v24 = vsel %vm544_vm0, %v595_v60, %v597_v30  ;;  %v683_v32 = vmax.f32 %v492_v5, %v596_v23  ;;  %v118_v55 = vld [vmem:[%s2750_s0 + $0x370] sm:$0xff]  ;;  %v3067_v43 = vld [vmem:[#allocation75_spill] sm:$0xff] }
  0xae   :  { %v600_v47 = vsel %vm544_vm0, %v597_v30, %v599_v41  ;;  %v686_v33 = vmax.f32 %v495_v13, %v599_v41  ;;  %v684_v17 = vmax.f32 %v493_v9, %v598_v24  ;;  %v322_v19 = vmax.f32 %v2490_v63, %v222_v29  ;;  %v3065_v13 = vld [vmem:[#allocation73_spill] sm:$0xff]  ;;  %v117_v29 = vld [vmem:[%s2750_s0 + $0x368] sm:$0xff]  ;;  %v3068_v60 = vld [vmem:[#allocation76_spill] sm:$0xff] }
  0xaf   :  { %v1116_v48 = vrot.slane %v1069_v8, 3  ;;  %v1117_v1 = vrot.slane %v1070_v46, 3  ;;  %v685_v25 = vmax.f32 %v494_v27, %v600_v47  ;;  %v323_v42 = vmax.f32 %v2494_v4, %v223_v37  ;;  %v3071_v24 = vld [vmem:[#allocation16_spill] sm:$0xff] }
  0xb0   :  { %v790_v26 = vrot.slane %v686_v33, 2  ;;  %v785_v59 = vrot.slane %v683_v32, 2  ;;  %v786_v53 = vrot.slane %v684_v17, 2  ;;  %v404_v36 = vmax.f32 %v3061_v44, %v320_v51 }
  0xb1   :  { %v1118_v6 = vsel %vm1097_vm3, %v1116_v48, %v1117_v1  ;;  %v1161_v7 = vmax.f32 %v1070_v46, %v1117_v1  ;;  %v788_v40 = vrot.slane %v685_v25, 2  ;;  %v405_v63 = vmax.f32 %v3062_v0, %v321_v61  ;;  %v3069_v46 = vld [vmem:[#allocation15_spill] sm:$0xff]  ;;  %v119_v1 = vld [vmem:[%s2750_s0 + $0x378] sm:$0xf] }
  0xb2   :  { %v1160_v3 = vmax.f32 %v1069_v8, %v1118_v6  ;;  %v877_v22 = vmax.f32 %v686_v33, %v790_v26  ;;  %v787_v35 = vsel %vm735_vm1, %v785_v59, %v786_v53  ;;  %v406_v4 = vmax.f32 %v3063_v14, %v322_v19  ;;  %v3070_v61 = vld [vmem:[#allocation11_spill] sm:$0xff]  ;;  %v3072_v33 = vld [vmem:[#allocation12_spill] sm:$0xff] }
  0xb3   :  { %1181 = vst [vmem:[%s2751_s1 + $0x68] sm:$0x3] %v1161_v7  ;;  %v407_v38 = vmax.f32 %v3064_v52, %v323_v42  ;;  %v789_v45 = vsel %vm735_vm1, %v786_v53, %v788_v40  ;;  %v791_v5 = vsel %vm735_vm1, %v788_v40, %v790_v26  ;;  %v874_v9 = vmax.f32 %v683_v32, %v787_v35 }
  0xb4   :  { %1180 = vst [vmem:[%s2751_s1 + $0x60] sm:$0xff] %v1160_v3  ;;  %v981_v62 = vrot.slane %v877_v22, 4  ;;  %v875_v27 = vmax.f32 %v684_v17, %v789_v45  ;;  %v876_v28 = vmax.f32 %v685_v25, %v791_v5  ;;  %v456_v2 = vmax.f32 %v3065_v13, %v404_v36 }
  0xb5   :  { %v457_v16 = vmax.f32 %v3066_v56, %v405_v63  ;;  %v976_v31 = vrot.slane %v874_v9, 4  ;;  %v458_v12 = vmax.f32 %v3067_v43, %v406_v4  ;;  %v459_v30 = vmax.f32 %v3068_v60, %v407_v38 }
  0xb6   :  { %v224_v41 = vmax.f32 %v2594_v10, %v116_v34  ;;  %v977_v37 = vrot.slane %v875_v27, 4  ;;  %v979_v8 = vrot.slane %v876_v28, 4  ;;  %v496_v51 = vmax.f32 %v3069_v46, %v456_v2  ;;  %v3073_v2 = vld [vmem:[#allocation13_spill] sm:$0xff]  ;;  %v3077_v46 = vld [vmem:[#allocation22_spill] sm:$0xff] }
  0xb7   :  { %v497_v23 = vmax.f32 %v3070_v61, %v457_v16  ;;  %v498_v47 = vmax.f32 %v3071_v24, %v458_v12  ;;  %v499_v48 = vmax.f32 %v3072_v33, %v459_v30  ;;  %v225_v32 = vmax.f32 %v2618_v15, %v117_v29  ;;  %v3074_v16 = vld [vmem:[#allocation9_spill] sm:$0xff]  ;;  %v3078_v61 = vld [vmem:[#allocation23_spill] sm:$0xff]  ;;  %v3079_v24 = vld [vmem:[#allocation24_spill] sm:$0xff] }
  0xb8   :  { %v226_v17 = vmax.f32 %v2627_v54, %v118_v55  ;;  %v978_v10 = vsel %vm926_vm2, %v976_v31, %v977_v37  ;;  %v980_v25 = vsel %vm926_vm2, %v977_v37, %v979_v8  ;;  %v982_v26 = vsel %vm926_vm2, %v979_v8, %v981_v62  ;;  %v3075_v31 = vld [vmem:[#allocation14_spill] sm:$0xff] }
  0xb9   :  { %v601_v19 = vrot.slane %v496_v51, 1  ;;  %v1048_v42 = vmax.f32 %v874_v9, %v978_v10  ;;  %v1049_v6 = vmax.f32 %v875_v27, %v980_v25  ;;  %v1050_v7 = vmax.f32 %v876_v28, %v982_v26  ;;  %v3076_v37 = vld [vmem:[#allocation10_spill] sm:$0xff] }
  0xba   :  { %v602_v59 = vrot.slane %v497_v23, 1  ;;  %v604_v53 = vrot.slane %v498_v47, 1  ;;  %v606_v3 = vrot.slane %v499_v48, 1  ;;  %v227_v40 = vmax.f32 %v2638_v39, %v119_v1 }
  0xbb   :  { %v324_v22 = vmax.f32 %v2548_v57, %v224_v41  ;;  %v1071_v15 = vmax.f32 %v1048_v42, %v1049_v6  ;;  %v1072_v44 = vmax.f32 %v1049_v6, %v1050_v7  ;;  %v325_v36 = vmax.f32 %v2573_v20, %v225_v32  ;;  %v3080_v32 = vld [vmem:[#allocation37_spill] sm:$0xff] }
  0xbc   :  { %v603_v54 = vsel %vm544_vm0, %v601_v19, %v602_v59  ;;  %v605_v35 = vsel %vm544_vm0, %v602_v59, %v604_v53  ;;  %v607_v0 = vsel %vm544_vm0, %v604_v53, %v606_v3  ;;  %v690_v14 = vmax.f32 %v499_v48, %v606_v3 }
  0xbd   :  { %v687_v63 = vmax.f32 %v496_v51, %v603_v54  ;;  %v1119_v4 = vrot.slane %v1071_v15, 3  ;;  %v1120_v52 = vrot.slane %v1072_v44, 3  ;;  %v688_v38 = vmax.f32 %v497_v23, %v605_v35 }
  0xbe   :  { %v689_v34 = vmax.f32 %v498_v47, %v607_v0  ;;  %v797_v39 = vrot.slane %v690_v14, 2  ;;  %v326_v57 = vmax.f32 %v2577_v18, %v226_v17  ;;  %v327_v5 = vmax.f32 %v2581_v58, %v227_v40 }
  0xbf   :  { %v792_v45 = vrot.slane %v687_v63, 2  ;;  %v1121_v9 = vsel %vm1097_vm3, %v1119_v4, %v1120_v52  ;;  %v1163_v62 = vmax.f32 %v1072_v44, %v1120_v52  ;;  %v793_v20 = vrot.slane %v688_v38, 2 }
  0xc0   :  { %v795_v27 = vrot.slane %v689_v34, 2  ;;  %v1162_v28 = vmax.f32 %v1071_v15, %v1121_v9  ;;  %v881_v13 = vmax.f32 %v690_v14, %v797_v39  ;;  %v408_v56 = vmax.f32 %v3073_v2, %v324_v22 }
  0xc1   :  { %v409_v29 = vmax.f32 %v3074_v16, %v325_v36  ;;  %1183 = vst [vmem:[%s2751_s1 + $0x78] sm:$0x3] %v1163_v62  ;;  %v794_v55 = vsel %vm735_vm1, %v792_v45, %v793_v20  ;;  %v410_v43 = vmax.f32 %v3075_v31, %v326_v57  ;;  %v411_v8 = vmax.f32 %v3076_v37, %v327_v5 }
  0xc2   :  { %v796_v18 = vsel %vm735_vm1, %v793_v20, %v795_v27  ;;  %v798_v58 = vsel %vm735_vm1, %v795_v27, %v797_v39  ;;  %1182 = vst [vmem:[%s2751_s1 + $0x70] sm:$0xff] %v1162_v28  ;;  %v878_v12 = vmax.f32 %v687_v63, %v794_v55  ;;  %v988_v41 = vrot.slane %v881_v13, 4 }
  0xc3   :  { %v879_v60 = vmax.f32 %v688_v38, %v796_v18  ;;  %v880_v30 = vmax.f32 %v689_v34, %v798_v58  ;;  %v460_v51 = vmax.f32 %v3077_v46, %v408_v56  ;;  %v461_v23 = vmax.f32 %v3078_v61, %v409_v29 }
  0xc4   :  { %v462_v47 = vmax.f32 %v3079_v24, %v410_v43  ;;  %v983_v33 = vrot.slane %v878_v12, 4  ;;  %v463_v17 = vmax.f32 %v3080_v32, %v411_v8 }
  0xc5   :  { %v984_v48 = vrot.slane %v879_v60, 4  ;;  %v986_v1 = vrot.slane %v880_v30, 4  ;;  %v500_v10 = vmax.f32 %v2530_v50, %v460_v51  ;;  %v501_v25 = vmax.f32 %v2533_v11, %v461_v23 }
  0xc6   :  { %v502_v26 = vmax.f32 %v2536_v49, %v462_v47  ;;  %v503_v3 = vmax.f32 %v2539_v21, %v463_v17 }
  0xc7   :  { %v985_v19 = vsel %vm926_vm2, %v983_v33, %v984_v48  ;;  %v987_v42 = vsel %vm926_vm2, %v984_v48, %v986_v1  ;;  %v989_v6 = vsel %vm926_vm2, %v986_v1, %v988_v41  ;;  %v608_v40 = vrot.slane %v500_v10, 1 }
  0xc8   :  { %v1051_v7 = vmax.f32 %v878_v12, %v985_v19  ;;  %v1052_v59 = vmax.f32 %v879_v60, %v987_v42  ;;  %v1053_v53 = vmax.f32 %v880_v30, %v989_v6  ;;  %v609_v22 = vrot.slane %v501_v25, 1 }
  0xc9   :  { %v611_v15 = vrot.slane %v502_v26, 1  ;;  %v613_v54 = vrot.slane %v503_v3, 1 }
  0xca   :  { %v1073_v44 = vmax.f32 %v1051_v7, %v1052_v59  ;;  %v1074_v50 = vmax.f32 %v1052_v59, %v1053_v53  ;;  %v610_v11 = vsel %vm544_vm0, %v608_v40, %v609_v22 }
  0xcb   :  { %v612_v49 = vsel %vm544_vm0, %v609_v22, %v611_v15  ;;  %v614_v0 = vsel %vm544_vm0, %v611_v15, %v613_v54  ;;  %v691_v63 = vmax.f32 %v500_v10, %v610_v11  ;;  %v694_v52 = vmax.f32 %v503_v3, %v613_v54 }
  0xcc   :  { %v1122_v36 = vrot.slane %v1073_v44, 3  ;;  %v1123_v35 = vrot.slane %v1074_v50, 3  ;;  %v692_v14 = vmax.f32 %v501_v25, %v612_v49  ;;  %v693_v4 = vmax.f32 %v502_v26, %v614_v0 }
  0xcd   :  { %v799_v34 = vrot.slane %v691_v63, 2  ;;  %v804_v5 = vrot.slane %v694_v52, 2 }
  0xce   :  { %v1124_v21 = vsel %vm1097_vm3, %v1122_v36, %v1123_v35  ;;  %v1165_v38 = vmax.f32 %v1074_v50, %v1123_v35  ;;  %v800_v39 = vrot.slane %v692_v14, 2  ;;  %v802_v57 = vrot.slane %v693_v4, 2 }
  0xcf   :  { %v1164_v45 = vmax.f32 %v1073_v44, %v1124_v21  ;;  %v885_v27 = vmax.f32 %v694_v52, %v804_v5 }
  0xd0   :  { %1185 = vst [vmem:[%s2751_s1 + $0x88] sm:$0x3] %v1165_v38  ;;  %v801_v9 = vsel %vm735_vm1, %v799_v34, %v800_v39  ;;  %v803_v62 = vsel %vm735_vm1, %v800_v39, %v802_v57  ;;  %v805_v20 = vsel %vm735_vm1, %v802_v57, %v804_v5 }
  0xd1   :  { %1184 = vst [vmem:[%s2751_s1 + $0x80] sm:$0xff] %v1164_v45  ;;  %v882_v28 = vmax.f32 %v691_v63, %v801_v9  ;;  %v883_v13 = vmax.f32 %v692_v14, %v803_v62  ;;  %v884_v2 = vmax.f32 %v693_v4, %v805_v20  ;;  %v995_v56 = vrot.slane %v885_v27, 4 }
  0xd3   :  { %v990_v16 = vrot.slane %v882_v28, 4  ;;  %v991_v29 = vrot.slane %v883_v13, 4  ;;  %v993_v55 = vrot.slane %v884_v2, 4 }
  0xd5   :  { %v992_v18 = vsel %vm926_vm2, %v990_v16, %v991_v29  ;;  %v994_v58 = vsel %vm926_vm2, %v991_v29, %v993_v55  ;;  %v996_v31 = vsel %vm926_vm2, %v993_v55, %v995_v56 }
  0xd6   :  { %v1054_v43 = vmax.f32 %v882_v28, %v992_v18  ;;  %v1055_v12 = vmax.f32 %v883_v13, %v994_v58  ;;  %v1056_v60 = vmax.f32 %v884_v2, %v996_v31 }
  0xd8   :  { %v1075_v30 = vmax.f32 %v1054_v43, %v1055_v12  ;;  %v1076_v41 = vmax.f32 %v1055_v12, %v1056_v60 }
  0xda   :  { %v1125_v37 = vrot.slane %v1075_v30, 3  ;;  %v1126_v8 = vrot.slane %v1076_v41, 3 }
  0xdc   :  { %v1127_v46 = vsel %vm1097_vm3, %v1125_v37, %v1126_v8  ;;  %v1167_v51 = vmax.f32 %v1076_v41, %v1126_v8 }
  0xdd   :  { %v1166_v61 = vmax.f32 %v1075_v30, %v1127_v46 }
  0xde   :  { %1187 = vst [vmem:[%s2751_s1 + $0x98] sm:$0x3] %v1167_v51 }
  0xdf   :  { %1186 = vst [vmem:[%s2751_s1 + $0x90] sm:$0xff] %v1166_v61 }

</bundles_post_ra>
